<compile_context>
chip_gen: v7x
topology: tpu7x:2x2x1
jax: 0.10.0
libtpu: 0.0.40
codegen_flags: <defaults>
</compile_context>

<pallas_src>
import functools

import jax
import jax.numpy as jnp
from jax import lax
from jax.experimental import pallas as pl
from jax.experimental.pallas import tpu as pltpu


def _dsconv_kernel(x_ref, dw_w_ref, dw_b_ref, pw_w_ref, pw_b_ref, out_ref, *,
                   stride, tile_rows):
    """One (batch, output-row-block) tile per grid step.

    x_ref   : (1, H+2, W, C_in)   NHWC input, H padded by the conv halo
    dw_w_ref: (9, C_in)           depthwise 3x3 taps (ky*3+kx, c), BN-scale folded
    dw_b_ref: (1, C_in)           folded depthwise BN bias
    pw_w_ref: (C_in, C_out) bf16  pointwise weights, BN-scale folded
    pw_b_ref: (1, C_out)          folded pointwise BN bias
    out_ref : (1, ROWS, W_out, C_out)  this step's block of output rows
    """
    _, _, w, c_in = x_ref.shape
    _, rows_step, w_out, c_out = out_ref.shape
    th = tile_rows
    nt = rows_step // th

    # ---- hoisted small operands (avoid re-broadcasting inside the loop) ----
    dw_w = dw_w_ref[...]                                    # (9, C_in)
    taps = [dw_w[k].reshape(1, 1, c_in) for k in range(9)]
    dw_b = dw_b_ref[...].reshape(1, 1, c_in)
    pw_w = pw_w_ref[...]                                    # (C_in, C_out) bf16
    pw_b = pw_b_ref[...].reshape(1, c_out)

    # Column-edge masks for the two deferred W shifts (replaces W padding).
    col = lax.broadcasted_iota(jnp.int32, (1, w, 1), 1)
    not_first = col > 0
    not_last = col < (w - 1)

    # First padded-input row covered by this grid step's output-row block.
    step_row0 = pl.multiple_of(
        pl.program_id(1) * (rows_step * stride), rows_step * stride)

    # ---- fused depthwise + pointwise, one small row tile at a time --------
    for i in range(nt):                       # static, unrolled (nt is small)
        base = step_row0 + i * (th * stride)

        def band(ky, base=base):
            # input rows r*stride + ky - 1  ==  padded rows r*stride + ky
            if stride == 1:
                return x_ref[0, pl.ds(base + ky, th), :, :]
            return x_ref[0, pl.ds(base + ky, th, stride=stride), :, :]

        b0, b1, b2 = band(0), band(1), band(2)

        # Three accumulators; W shifts are deferred (roll and the per-channel
        # weights commute), so only band*weight VPU work happens per tap.
        acc_c = b0 * taps[1] + b1 * taps[4] + b2 * taps[7]   # kx = 1 (center)
        acc_l = b0 * taps[0] + b1 * taps[3] + b2 * taps[6]   # kx = 0 (x[c-1])
        acc_r = b0 * taps[2] + b1 * taps[5] + b2 * taps[8]   # kx = 2 (x[c+1])

        # One XLU sublane roll + one mask per deferred direction.
        dwv = (acc_c
               + jnp.where(not_first, pltpu.roll(acc_l, shift=1, axis=1), 0.0)
               + jnp.where(not_last,
                           pltpu.roll(acc_r, shift=w - 1, axis=1), 0.0))

        if stride > 1:
            # H was already subsampled via strided band reads; only W remains.
            dwv = dwv[:, ::stride, :]

        # depthwise folded BN bias + ReLU (scale already in the weights)
        hact = jnp.maximum(dwv + dw_b, 0.0)

        # pointwise 1x1 conv == bf16 MXU matmul over channels
        hm = hact.reshape(th * w_out, c_in).astype(jnp.bfloat16)
        y = jnp.dot(hm, pw_w, preferred_element_type=jnp.float32)
        y = jnp.maximum(y + pw_b, 0.0)

        out_ref[0, pl.ds(i * th, th), :, :] = (
            y.reshape(th, w_out, c_out).astype(out_ref.dtype))


def _round_up(v, m):
    return (v + m - 1) // m * m


def _pick_row_tiling(h_out):
    """(output rows per grid step, rows per inner fused sub-tile)."""
    rows_step = next((c for c in (32, 16, 8) if h_out % c == 0), h_out)
    tile_rows = next((c for c in (8, 4, 2) if rows_step % c == 0), rows_step)
    return rows_step, tile_rows


@functools.partial(jax.jit, static_argnames=("stride", "eps"))
def depth_sep_conv_block(x_nchw, params, *, stride=1, eps=1e-5):
    """Pallas implementation of DepthSeptConvBlock.forward (eval-mode BN)."""
    (dw_w, dw_b, dw_g, dw_beta, dw_mean, dw_var,
     pw_w, pw_b, pw_g, pw_beta, pw_mean, pw_var) = params

    c_in = dw_w.shape[0]
    c_out = pw_w.shape[0]
    n, _, h, w = x_nchw.shape
    h_out = (h - 1) // stride + 1
    w_out = (w - 1) // stride + 1

    # lane-dense channel padding (multiples of 128); no-op for aligned layers
    cp_in = _round_up(max(c_in, 128), 128)
    cp_out = _round_up(max(c_out, 128), 128)

    # ---- glue: layout + halo/channel padding (one fused XLA pad) ----------
    x = jnp.transpose(x_nchw, (0, 2, 3, 1)).astype(jnp.float32)   # NCHW->NHWC
    x = jnp.pad(x, ((0, 0), (1, 1), (0, 0), (0, cp_in - c_in)))

    # ---- BN folding (eval mode) -------------------------------------------
    dw_scale = dw_g / jnp.sqrt(dw_var + eps)
    dw_bias = (dw_b - dw_mean) * dw_scale + dw_beta
    pw_scale = pw_g / jnp.sqrt(pw_var + eps)
    pw_bias = (pw_b - pw_mean) * pw_scale + pw_beta

    # depthwise weight (C_in,1,3,3) -> (9, C_in), BN scale folded per channel
    dw_w_flat = jnp.transpose(dw_w.reshape(c_in, 9), (1, 0)) * dw_scale[None, :]
    dw_w_flat = jnp.pad(dw_w_flat,
                        ((0, 0), (0, cp_in - c_in))).astype(jnp.float32)
    dw_bias_p = jnp.pad(dw_bias,
                        (0, cp_in - c_in)).reshape(1, cp_in).astype(jnp.float32)

    # pointwise weight (C_out,C_in,1,1) -> (C_in, C_out), BN scale folded per
    # output column, bf16 for the MXU.
    pw_w_mat = jnp.transpose(pw_w.reshape(c_out, c_in), (1, 0)) * pw_scale[None, :]
    pw_w_mat = jnp.pad(pw_w_mat, ((0, cp_in - c_in),
                                  (0, cp_out - c_out))).astype(jnp.bfloat16)
    pw_bias_p = jnp.pad(pw_bias,
                        (0, cp_out - c_out)).reshape(1, cp_out).astype(jnp.float32)

    rows_step, tile_rows = _pick_row_tiling(h_out)
    grid = (n, h_out // rows_step)

    kernel = functools.partial(_dsconv_kernel, stride=stride,
                               tile_rows=tile_rows)

    out_nhwc = pl.pallas_call(
        kernel,
        out_shape=jax.ShapeDtypeStruct((n, h_out, w_out, cp_out), jnp.float32),
        grid_spec=pltpu.PrefetchScalarGridSpec(
            num_scalar_prefetch=0,
            grid=grid,
            in_specs=[
                # whole padded image stays resident across the row-block axis
                pl.BlockSpec((1, h + 2, w, cp_in), lambda b, t: (b, 0, 0, 0)),
                pl.BlockSpec((9, cp_in), lambda b, t: (0, 0)),
                pl.BlockSpec((1, cp_in), lambda b, t: (0, 0)),
                pl.BlockSpec((cp_in, cp_out), lambda b, t: (0, 0)),
                pl.BlockSpec((1, cp_out), lambda b, t: (0, 0)),
            ],
            out_specs=pl.BlockSpec((1, rows_step, w_out, cp_out),
                                   lambda b, t: (b, t, 0, 0)),
        ),
        compiler_params=pltpu.CompilerParams(
            dimension_semantics=("parallel", "parallel"),
            vmem_limit_bytes=40 * 1024 * 1024),
    )(x, dw_w_flat, dw_bias_p, pw_w_mat, pw_bias_p)

    out = out_nhwc[..., :c_out]                      # drop lane padding
    return jnp.transpose(out, (0, 3, 1, 2))          # NHWC -> NCHW


def _reference(x_nchw, params, *, stride=1, eps=1e-5):
    """Pure-JAX reference (lax convs) mirroring the PyTorch forward (eval BN)."""
    (dw_w, dw_b, dw_g, dw_beta, dw_mean, dw_var,
     pw_w, pw_b, pw_g, pw_beta, pw_mean, pw_var) = params
    c_in = dw_w.shape[0]

    y = lax.conv_general_dilated(
        x_nchw, dw_w, window_strides=(stride, stride), padding=((1, 1), (1, 1)),
        dimension_numbers=("NCHW", "OIHW", "NCHW"), feature_group_count=c_in)
    y = y + dw_b.reshape(1, -1, 1, 1)
    y = (y - dw_mean.reshape(1, -1, 1, 1)) / jnp.sqrt(dw_var.reshape(1, -1, 1, 1) + eps)
    y = y * dw_g.reshape(1, -1, 1, 1) + dw_beta.reshape(1, -1, 1, 1)
    y = jnp.maximum(y, 0.0)

    z = lax.conv_general_dilated(
        y, pw_w, window_strides=(1, 1), padding=((0, 0), (0, 0)),
        dimension_numbers=("NCHW", "OIHW", "NCHW"))
    z = z + pw_b.reshape(1, -1, 1, 1)
    z = (z - pw_mean.reshape(1, -1, 1, 1)) / jnp.sqrt(pw_var.reshape(1, -1, 1, 1) + eps)
    z = z * pw_g.reshape(1, -1, 1, 1) + pw_beta.reshape(1, -1, 1, 1)
    return jnp.maximum(z, 0.0)


def _init_params(key, c_in, c_out):
    ks = jax.random.split(key, 8)
    dw_w = 0.3 * jax.random.normal(ks[0], (c_in, 1, 3, 3), jnp.float32)
    dw_b = 0.1 * jax.random.normal(ks[1], (c_in,), jnp.float32)
    dw_g = 1.0 + 0.1 * jax.random.normal(ks[2], (c_in,), jnp.float32)
    dw_beta = 0.1 * jax.random.normal(ks[3], (c_in,), jnp.float32)
    dw_mean = 0.05 * jax.random.normal(ks[4], (c_in,), jnp.float32)
    dw_var = 0.5 + jnp.abs(0.5 * jax.random.normal(ks[5], (c_in,), jnp.float32))

    pw_w = 0.3 * jax.random.normal(ks[6], (c_out, c_in, 1, 1), jnp.float32)
    pw_b = 0.1 * jax.random.normal(ks[7], (c_out,), jnp.float32)
    k2 = jax.random.split(ks[7], 4)
    pw_g = 1.0 + 0.1 * jax.random.normal(k2[0], (c_out,), jnp.float32)
    pw_beta = 0.1 * jax.random.normal(k2[1], (c_out,), jnp.float32)
    pw_mean = 0.05 * jax.random.normal(k2[2], (c_out,), jnp.float32)
    pw_var = 0.5 + jnp.abs(0.5 * jax.random.normal(k2[3], (c_out,), jnp.float32))

    return (dw_w, dw_b, dw_g, dw_beta, dw_mean, dw_var,
            pw_w, pw_b, pw_g, pw_beta, pw_mean, pw_var)


if __name__ == "__main__":
    key = jax.random.PRNGKey(0)
    kx, kp = jax.random.split(key)

    N, C_IN, C_OUT, H, W = 2, 4, 8, 16, 16
    STRIDE = 1

    x = jax.random.normal(kx, (N, C_IN, H, W), jnp.float32)   # NCHW, like torch
    params = _init_params(kp, C_IN, C_OUT)

    out = depth_sep_conv_block(x, params, stride=STRIDE)
    out = jax.block_until_ready(out)

    ref = jax.block_until_ready(_reference(x, params, stride=STRIDE))
    assert out.shape == (N, C_OUT, H, W), out.shape
    # bf16 pointwise matmul -> slightly looser tolerance than pure-f32.
    assert jnp.allclose(out, ref, atol=2e-2, rtol=2e-2), \
        float(jnp.max(jnp.abs(out - ref)))

    print("KERNEL_OK")
</pallas_src>

<mosaic_0001>
module attributes {stable_mosaic.version = 11 : i64} {
  func.func @_dsconv_kernel(%arg0: i32, %arg1: i32, %arg2: memref<1x18x16x128xf32, #tpu.memory_space<vmem>>, %arg3: memref<9x128xf32, #tpu.memory_space<vmem>>, %arg4: memref<1x128xf32, #tpu.memory_space<vmem>>, %arg5: memref<128x128xbf16, #tpu.memory_space<vmem>>, %arg6: memref<1x128xf32, #tpu.memory_space<vmem>>, %arg7: memref<1x16x16x128xf32, #tpu.memory_space<vmem>>) attributes {dimension_semantics = [#tpu.dimension_semantics<parallel>, #tpu.dimension_semantics<parallel>], iteration_bounds = array<i64: 2, 1>, scalar_prefetch = 0 : i64, scratch_operands = 0 : i64, tpu.core_type = #tpu.core_type<tc>, window_params = [{transform_indices = @transform_0, window_bounds = array<i64: 1, 18, 16, 128>}, {pipeline_mode = #tpu.pipeline_mode<synchronous>, transform_indices = @transform_1, window_bounds = array<i64: 9, 128>}, {pipeline_mode = #tpu.pipeline_mode<synchronous>, transform_indices = @transform_2, window_bounds = array<i64: 1, 128>}, {pipeline_mode = #tpu.pipeline_mode<synchronous>, transform_indices = @transform_3, window_bounds = array<i64: 128, 128>}, {pipeline_mode = #tpu.pipeline_mode<synchronous>, transform_indices = @transform_4, window_bounds = array<i64: 1, 128>}, {transform_indices = @transform_5, window_bounds = array<i64: 1, 16, 16, 128>}]} {
    %c0 = arith.constant 0 : index
    %c0_0 = arith.constant 0 : index
    %0 = vector.load %arg3[%c0, %c0_0] : memref<9x128xf32, #tpu.memory_space<vmem>>, vector<9x128xf32>
    %1 = vector.extract_strided_slice %0 {offsets = [0, 0], sizes = [1, 128], strides = [1, 1]} : vector<9x128xf32> to vector<1x128xf32>
    %2 = vector.shape_cast %1 : vector<1x128xf32> to vector<128xf32>
    %3 = vector.shape_cast %2 : vector<128xf32> to vector<1x1x128xf32>
    %4 = vector.extract_strided_slice %0 {offsets = [1, 0], sizes = [1, 128], strides = [1, 1]} : vector<9x128xf32> to vector<1x128xf32>
    %5 = vector.shape_cast %4 : vector<1x128xf32> to vector<128xf32>
    %6 = vector.shape_cast %5 : vector<128xf32> to vector<1x1x128xf32>
    %7 = vector.extract_strided_slice %0 {offsets = [2, 0], sizes = [1, 128], strides = [1, 1]} : vector<9x128xf32> to vector<1x128xf32>
    %8 = vector.shape_cast %7 : vector<1x128xf32> to vector<128xf32>
    %9 = vector.shape_cast %8 : vector<128xf32> to vector<1x1x128xf32>
    %10 = vector.extract_strided_slice %0 {offsets = [3, 0], sizes = [1, 128], strides = [1, 1]} : vector<9x128xf32> to vector<1x128xf32>
    %11 = vector.shape_cast %10 : vector<1x128xf32> to vector<128xf32>
    %12 = vector.shape_cast %11 : vector<128xf32> to vector<1x1x128xf32>
    %13 = vector.extract_strided_slice %0 {offsets = [4, 0], sizes = [1, 128], strides = [1, 1]} : vector<9x128xf32> to vector<1x128xf32>
    %14 = vector.shape_cast %13 : vector<1x128xf32> to vector<128xf32>
    %15 = vector.shape_cast %14 : vector<128xf32> to vector<1x1x128xf32>
    %16 = vector.extract_strided_slice %0 {offsets = [5, 0], sizes = [1, 128], strides = [1, 1]} : vector<9x128xf32> to vector<1x128xf32>
    %17 = vector.shape_cast %16 : vector<1x128xf32> to vector<128xf32>
    %18 = vector.shape_cast %17 : vector<128xf32> to vector<1x1x128xf32>
    %19 = vector.extract_strided_slice %0 {offsets = [6, 0], sizes = [1, 128], strides = [1, 1]} : vector<9x128xf32> to vector<1x128xf32>
    %20 = vector.shape_cast %19 : vector<1x128xf32> to vector<128xf32>
    %21 = vector.shape_cast %20 : vector<128xf32> to vector<1x1x128xf32>
    %22 = vector.extract_strided_slice %0 {offsets = [7, 0], sizes = [1, 128], strides = [1, 1]} : vector<9x128xf32> to vector<1x128xf32>
    %23 = vector.shape_cast %22 : vector<1x128xf32> to vector<128xf32>
    %24 = vector.shape_cast %23 : vector<128xf32> to vector<1x1x128xf32>
    %25 = vector.extract_strided_slice %0 {offsets = [8, 0], sizes = [1, 128], strides = [1, 1]} : vector<9x128xf32> to vector<1x128xf32>
    %26 = vector.shape_cast %25 : vector<1x128xf32> to vector<128xf32>
    %27 = vector.shape_cast %26 : vector<128xf32> to vector<1x1x128xf32>
    %c0_1 = arith.constant 0 : index
    %c0_2 = arith.constant 0 : index
    %28 = vector.load %arg4[%c0_1, %c0_2] : memref<1x128xf32, #tpu.memory_space<vmem>>, vector<1x128xf32>
    %29 = vector.shape_cast %28 : vector<1x128xf32> to vector<1x1x128xf32>
    %c0_3 = arith.constant 0 : index
    %c0_4 = arith.constant 0 : index
    %30 = vector.load %arg5[%c0_3, %c0_4] : memref<128x128xbf16, #tpu.memory_space<vmem>>, vector<128x128xbf16>
    %c0_5 = arith.constant 0 : index
    %c0_6 = arith.constant 0 : index
    %31 = vector.load %arg6[%c0_5, %c0_6] : memref<1x128xf32, #tpu.memory_space<vmem>>, vector<1x128xf32>
    %32 = tpu.iota {dimensions = array<i32: 1>} : vector<1x16x1xi32>
    %c0_i32 = arith.constant 0 : i32
    %33 = vector.broadcast %c0_i32 : i32 to vector<1x16x1xi32>
    %34 = arith.cmpi sgt, %32, %33 : vector<1x16x1xi32>
    %c15_i32 = arith.constant 15 : i32
    %35 = vector.broadcast %c15_i32 : i32 to vector<1x16x1xi32>
    %36 = arith.cmpi slt, %32, %35 : vector<1x16x1xi32>
    %c16_i32 = arith.constant 16 : i32
    %37 = arith.muli %arg1, %c16_i32 : i32
    %38 = tpu.assume_multiple %37, 16 : i32
    %c0_i32_7 = arith.constant 0 : i32
    %39 = arith.addi %38, %c0_i32_7 : i32
    %c0_i32_8 = arith.constant 0 : i32
    %40 = arith.addi %39, %c0_i32_8 : i32
    %c0_9 = arith.constant 0 : index
    %41 = arith.index_cast %40 : i32 to index
    %c0_10 = arith.constant 0 : index
    %c0_11 = arith.constant 0 : index
    %42 = vector.load %arg2[%c0_9, %41, %c0_10, %c0_11] : memref<1x18x16x128xf32, #tpu.memory_space<vmem>>, vector<1x8x16x128xf32>
    %43 = vector.shape_cast %42 : vector<1x8x16x128xf32> to vector<8x16x128xf32>
    %c1_i32 = arith.constant 1 : i32
    %44 = arith.addi %39, %c1_i32 : i32
    %c0_12 = arith.constant 0 : index
    %45 = arith.index_cast %44 : i32 to index
    %c0_13 = arith.constant 0 : index
    %c0_14 = arith.constant 0 : index
    %46 = vector.load %arg2[%c0_12, %45, %c0_13, %c0_14] : memref<1x18x16x128xf32, #tpu.memory_space<vmem>>, vector<1x8x16x128xf32>
    %47 = vector.shape_cast %46 : vector<1x8x16x128xf32> to vector<8x16x128xf32>
    %c2_i32 = arith.constant 2 : i32
    %48 = arith.addi %39, %c2_i32 : i32
    %c0_15 = arith.constant 0 : index
    %49 = arith.index_cast %48 : i32 to index
    %c0_16 = arith.constant 0 : index
    %c0_17 = arith.constant 0 : index
    %50 = vector.load %arg2[%c0_15, %49, %c0_16, %c0_17] : memref<1x18x16x128xf32, #tpu.memory_space<vmem>>, vector<1x8x16x128xf32>
    %51 = vector.shape_cast %50 : vector<1x8x16x128xf32> to vector<8x16x128xf32>
    %52 = vector.broadcast %6 : vector<1x1x128xf32> to vector<8x16x128xf32>
    %53 = arith.mulf %43, %52 : vector<8x16x128xf32>
    %54 = vector.broadcast %15 : vector<1x1x128xf32> to vector<8x16x128xf32>
    %55 = arith.mulf %47, %54 : vector<8x16x128xf32>
    %56 = arith.addf %53, %55 : vector<8x16x128xf32>
    %57 = vector.broadcast %24 : vector<1x1x128xf32> to vector<8x16x128xf32>
    %58 = arith.mulf %51, %57 : vector<8x16x128xf32>
    %59 = arith.addf %56, %58 : vector<8x16x128xf32>
    %60 = vector.broadcast %3 : vector<1x1x128xf32> to vector<8x16x128xf32>
    %61 = arith.mulf %43, %60 : vector<8x16x128xf32>
    %62 = vector.broadcast %12 : vector<1x1x128xf32> to vector<8x16x128xf32>
    %63 = arith.mulf %47, %62 : vector<8x16x128xf32>
    %64 = arith.addf %61, %63 : vector<8x16x128xf32>
    %65 = vector.broadcast %21 : vector<1x1x128xf32> to vector<8x16x128xf32>
    %66 = arith.mulf %51, %65 : vector<8x16x128xf32>
    %67 = arith.addf %64, %66 : vector<8x16x128xf32>
    %68 = vector.broadcast %9 : vector<1x1x128xf32> to vector<8x16x128xf32>
    %69 = arith.mulf %43, %68 : vector<8x16x128xf32>
    %70 = vector.broadcast %18 : vector<1x1x128xf32> to vector<8x16x128xf32>
    %71 = arith.mulf %47, %70 : vector<8x16x128xf32>
    %72 = arith.addf %69, %71 : vector<8x16x128xf32>
    %73 = vector.broadcast %27 : vector<1x1x128xf32> to vector<8x16x128xf32>
    %74 = arith.mulf %51, %73 : vector<8x16x128xf32>
    %75 = arith.addf %72, %74 : vector<8x16x128xf32>
    %c1_i32_18 = arith.constant 1 : i32
    %76 = tpu.dynamic_rotate %67 by %c1_i32_18 dim 1 : vector<8x16x128xf32>, i32 -> vector<8x16x128xf32>
    %cst = arith.constant 0.000000e+00 : f32
    %77 = vector.shape_cast %34 : vector<1x16x1xi1> to vector<1x16x1xi1>
    %78 = vector.broadcast %77 : vector<1x16x1xi1> to vector<8x16x128xi1>
    %79 = vector.broadcast %cst : f32 to vector<8x16x128xf32>
    %80 = arith.select %78, %76, %79 : vector<8x16x128xi1>, vector<8x16x128xf32>
    %81 = arith.addf %59, %80 : vector<8x16x128xf32>
    %c15_i32_19 = arith.constant 15 : i32
    %82 = tpu.dynamic_rotate %75 by %c15_i32_19 dim 1 : vector<8x16x128xf32>, i32 -> vector<8x16x128xf32>
    %cst_20 = arith.constant 0.000000e+00 : f32
    %83 = vector.shape_cast %36 : vector<1x16x1xi1> to vector<1x16x1xi1>
    %84 = vector.broadcast %83 : vector<1x16x1xi1> to vector<8x16x128xi1>
    %85 = vector.broadcast %cst_20 : f32 to vector<8x16x128xf32>
    %86 = arith.select %84, %82, %85 : vector<8x16x128xi1>, vector<8x16x128xf32>
    %87 = arith.addf %81, %86 : vector<8x16x128xf32>
    %88 = vector.broadcast %29 : vector<1x1x128xf32> to vector<8x16x128xf32>
    %89 = arith.addf %87, %88 : vector<8x16x128xf32>
    %cst_21 = arith.constant 0.000000e+00 : f32
    %90 = vector.broadcast %cst_21 : f32 to vector<8x16x128xf32>
    %91 = arith.maximumf %89, %90 : vector<8x16x128xf32>
    %92 = vector.shape_cast %91 : vector<8x16x128xf32> to vector<128x128xf32>
    %93 = arith.truncf %92 : vector<128x128xf32> to vector<128x128xbf16>
    %cst_22 = arith.constant dense<0.000000e+00> : vector<128x128xf32>
    %94 = tpu.matmul %93, %30, %cst_22 {dimension_numbers = #tpu.dot_dimension_numbers<[1], [0], [0], [1], [0, 0, 1, 1], [], []>} : vector<128x128xbf16>, vector<128x128xbf16>, vector<128x128xf32> -> vector<128x128xf32>
    %95 = vector.broadcast %31 : vector<1x128xf32> to vector<128x128xf32>
    %96 = arith.addf %94, %95 : vector<128x128xf32>
    %cst_23 = arith.constant 0.000000e+00 : f32
    %97 = vector.broadcast %cst_23 : f32 to vector<128x128xf32>
    %98 = arith.maximumf %96, %97 : vector<128x128xf32>
    %99 = vector.shape_cast %98 : vector<128x128xf32> to vector<8x16x128xf32>
    %c0_24 = arith.constant 0 : index
    %c0_25 = arith.constant 0 : index
    %c0_26 = arith.constant 0 : index
    %c0_27 = arith.constant 0 : index
    %100 = vector.load %arg7[%c0_24, %c0_25, %c0_26, %c0_27] : memref<1x16x16x128xf32, #tpu.memory_space<vmem>>, vector<1x8x16x128xf32>
    %101 = vector.shape_cast %100 : vector<1x8x16x128xf32> to vector<8x16x128xf32>
    %102 = vector.shape_cast %99 : vector<8x16x128xf32> to vector<1x8x16x128xf32>
    tpu.vector_store %arg7[%c0_24, %c0_25, %c0_26, %c0_27], %102 {strides = array<i32>} : memref<1x16x16x128xf32, #tpu.memory_space<vmem>>, vector<1x8x16x128xf32>,
    %c8_i32 = arith.constant 8 : i32
    %103 = arith.addi %38, %c8_i32 : i32
    %c0_i32_28 = arith.constant 0 : i32
    %104 = arith.addi %103, %c0_i32_28 : i32
    %c0_29 = arith.constant 0 : index
    %105 = arith.index_cast %104 : i32 to index
    %c0_30 = arith.constant 0 : index
    %c0_31 = arith.constant 0 : index
    %106 = vector.load %arg2[%c0_29, %105, %c0_30, %c0_31] : memref<1x18x16x128xf32, #tpu.memory_space<vmem>>, vector<1x8x16x128xf32>
    %107 = vector.shape_cast %106 : vector<1x8x16x128xf32> to vector<8x16x128xf32>
    %c1_i32_32 = arith.constant 1 : i32
    %108 = arith.addi %103, %c1_i32_32 : i32
    %c0_33 = arith.constant 0 : index
    %109 = arith.index_cast %108 : i32 to index
    %c0_34 = arith.constant 0 : index
    %c0_35 = arith.constant 0 : index
    %110 = vector.load %arg2[%c0_33, %109, %c0_34, %c0_35] : memref<1x18x16x128xf32, #tpu.memory_space<vmem>>, vector<1x8x16x128xf32>
    %111 = vector.shape_cast %110 : vector<1x8x16x128xf32> to vector<8x16x128xf32>
    %c2_i32_36 = arith.constant 2 : i32
    %112 = arith.addi %103, %c2_i32_36 : i32
    %c0_37 = arith.constant 0 : index
    %113 = arith.index_cast %112 : i32 to index
    %c0_38 = arith.constant 0 : index
    %c0_39 = arith.constant 0 : index
    %114 = vector.load %arg2[%c0_37, %113, %c0_38, %c0_39] : memref<1x18x16x128xf32, #tpu.memory_space<vmem>>, vector<1x8x16x128xf32>
    %115 = vector.shape_cast %114 : vector<1x8x16x128xf32> to vector<8x16x128xf32>
    %116 = vector.broadcast %6 : vector<1x1x128xf32> to vector<8x16x128xf32>
    %117 = arith.mulf %107, %116 : vector<8x16x128xf32>
    %118 = vector.broadcast %15 : vector<1x1x128xf32> to vector<8x16x128xf32>
    %119 = arith.mulf %111, %118 : vector<8x16x128xf32>
    %120 = arith.addf %117, %119 : vector<8x16x128xf32>
    %121 = vector.broadcast %24 : vector<1x1x128xf32> to vector<8x16x128xf32>
    %122 = arith.mulf %115, %121 : vector<8x16x128xf32>
    %123 = arith.addf %120, %122 : vector<8x16x128xf32>
    %124 = vector.broadcast %3 : vector<1x1x128xf32> to vector<8x16x128xf32>
    %125 = arith.mulf %107, %124 : vector<8x16x128xf32>
    %126 = vector.broadcast %12 : vector<1x1x128xf32> to vector<8x16x128xf32>
    %127 = arith.mulf %111, %126 : vector<8x16x128xf32>
    %128 = arith.addf %125, %127 : vector<8x16x128xf32>
    %129 = vector.broadcast %21 : vector<1x1x128xf32> to vector<8x16x128xf32>
    %130 = arith.mulf %115, %129 : vector<8x16x128xf32>
    %131 = arith.addf %128, %130 : vector<8x16x128xf32>
    %132 = vector.broadcast %9 : vector<1x1x128xf32> to vector<8x16x128xf32>
    %133 = arith.mulf %107, %132 : vector<8x16x128xf32>
    %134 = vector.broadcast %18 : vector<1x1x128xf32> to vector<8x16x128xf32>
    %135 = arith.mulf %111, %134 : vector<8x16x128xf32>
    %136 = arith.addf %133, %135 : vector<8x16x128xf32>
    %137 = vector.broadcast %27 : vector<1x1x128xf32> to vector<8x16x128xf32>
    %138 = arith.mulf %115, %137 : vector<8x16x128xf32>
    %139 = arith.addf %136, %138 : vector<8x16x128xf32>
    %c1_i32_40 = arith.constant 1 : i32
    %140 = tpu.dynamic_rotate %131 by %c1_i32_40 dim 1 : vector<8x16x128xf32>, i32 -> vector<8x16x128xf32>
    %cst_41 = arith.constant 0.000000e+00 : f32
    %141 = vector.shape_cast %34 : vector<1x16x1xi1> to vector<1x16x1xi1>
    %142 = vector.broadcast %141 : vector<1x16x1xi1> to vector<8x16x128xi1>
    %143 = vector.broadcast %cst_41 : f32 to vector<8x16x128xf32>
    %144 = arith.select %142, %140, %143 : vector<8x16x128xi1>, vector<8x16x128xf32>
    %145 = arith.addf %123, %144 : vector<8x16x128xf32>
    %c15_i32_42 = arith.constant 15 : i32
    %146 = tpu.dynamic_rotate %139 by %c15_i32_42 dim 1 : vector<8x16x128xf32>, i32 -> vector<8x16x128xf32>
    %cst_43 = arith.constant 0.000000e+00 : f32
    %147 = vector.shape_cast %36 : vector<1x16x1xi1> to vector<1x16x1xi1>
    %148 = vector.broadcast %147 : vector<1x16x1xi1> to vector<8x16x128xi1>
    %149 = vector.broadcast %cst_43 : f32 to vector<8x16x128xf32>
    %150 = arith.select %148, %146, %149 : vector<8x16x128xi1>, vector<8x16x128xf32>
    %151 = arith.addf %145, %150 : vector<8x16x128xf32>
    %152 = vector.broadcast %29 : vector<1x1x128xf32> to vector<8x16x128xf32>
    %153 = arith.addf %151, %152 : vector<8x16x128xf32>
    %cst_44 = arith.constant 0.000000e+00 : f32
    %154 = vector.broadcast %cst_44 : f32 to vector<8x16x128xf32>
    %155 = arith.maximumf %153, %154 : vector<8x16x128xf32>
    %156 = vector.shape_cast %155 : vector<8x16x128xf32> to vector<128x128xf32>
    %157 = arith.truncf %156 : vector<128x128xf32> to vector<128x128xbf16>
    %cst_45 = arith.constant dense<0.000000e+00> : vector<128x128xf32>
    %158 = tpu.matmul %157, %30, %cst_45 {dimension_numbers = #tpu.dot_dimension_numbers<[1], [0], [0], [1], [0, 0, 1, 1], [], []>} : vector<128x128xbf16>, vector<128x128xbf16>, vector<128x128xf32> -> vector<128x128xf32>
    %159 = vector.broadcast %31 : vector<1x128xf32> to vector<128x128xf32>
    %160 = arith.addf %158, %159 : vector<128x128xf32>
    %cst_46 = arith.constant 0.000000e+00 : f32
    %161 = vector.broadcast %cst_46 : f32 to vector<128x128xf32>
    %162 = arith.maximumf %160, %161 : vector<128x128xf32>
    %163 = vector.shape_cast %162 : vector<128x128xf32> to vector<8x16x128xf32>
    %c0_47 = arith.constant 0 : index
    %c8 = arith.constant 8 : index
    %c0_48 = arith.constant 0 : index
    %c0_49 = arith.constant 0 : index
    %164 = vector.load %arg7[%c0_47, %c8, %c0_48, %c0_49] : memref<1x16x16x128xf32, #tpu.memory_space<vmem>>, vector<1x8x16x128xf32>
    %165 = vector.shape_cast %164 : vector<1x8x16x128xf32> to vector<8x16x128xf32>
    %166 = vector.shape_cast %163 : vector<8x16x128xf32> to vector<1x8x16x128xf32>
    tpu.vector_store %arg7[%c0_47, %c8, %c0_48, %c0_49], %166 {strides = array<i32>} : memref<1x16x16x128xf32, #tpu.memory_space<vmem>>, vector<1x8x16x128xf32>,
    return
  }
  func.func @transform_0(%arg0: i32, %arg1: i32) -> (i32, i32, i32, i32) {
    %c0_i32 = arith.constant 0 : i32
    %c0_i32_0 = arith.constant 0 : i32
    %c0_i32_1 = arith.constant 0 : i32
    %c0_i32_2 = arith.constant 0 : i32
    return %arg0, %c0_i32, %c0_i32_0, %c0_i32_1 : i32, i32, i32, i32
  }
  func.func @transform_1(%arg0: i32, %arg1: i32) -> (i32, i32) {
    %c0_i32 = arith.constant 0 : i32
    %c0_i32_0 = arith.constant 0 : i32
    %c0_i32_1 = arith.constant 0 : i32
    return %c0_i32, %c0_i32_0 : i32, i32
  }
  func.func @transform_2(%arg0: i32, %arg1: i32) -> (i32, i32) {
    %c0_i32 = arith.constant 0 : i32
    %c0_i32_0 = arith.constant 0 : i32
    %c0_i32_1 = arith.constant 0 : i32
    return %c0_i32, %c0_i32_0 : i32, i32
  }
  func.func @transform_3(%arg0: i32, %arg1: i32) -> (i32, i32) {
    %c0_i32 = arith.constant 0 : i32
    %c0_i32_0 = arith.constant 0 : i32
    %c0_i32_1 = arith.constant 0 : i32
    return %c0_i32, %c0_i32_0 : i32, i32
  }
  func.func @transform_4(%arg0: i32, %arg1: i32) -> (i32, i32) {
    %c0_i32 = arith.constant 0 : i32
    %c0_i32_0 = arith.constant 0 : i32
    %c0_i32_1 = arith.constant 0 : i32
    return %c0_i32, %c0_i32_0 : i32, i32
  }
  func.func @transform_5(%arg0: i32, %arg1: i32) -> (i32, i32, i32, i32) {
    %c0_i32 = arith.constant 0 : i32
    %c0_i32_0 = arith.constant 0 : i32
    %c0_i32_1 = arith.constant 0 : i32
    return %arg0, %arg1, %c0_i32, %c0_i32_0 : i32, i32, i32, i32
  }
}

</mosaic_0001>

<bundles_post_ra>
// kernel: depth_sep_conv_block.1
= control target key start
LH: loop header
LB: loop body
LE: loop exit
PB: predicated region body
PF: predicated region fallthrough
CT: control target
= control target key end

     0   :  { %s1985_s18 = smov 0   ;;  %s1987_s19 = smov 0   ;;  %s3055_s0 = inlined_call_operand.vmem [shape: f32[2,18,16,128], index: 0, kind: input, shape index: {}]   ;;  %s3056_s1 = inlined_call_operand.vmem [shape: f32[9,128], index: 1, kind: input, shape index: {}]   ;;  %s3057_s2 = inlined_call_operand.vmem [shape: f32[1,128], index: 2, kind: input, shape index: {}]   ;;  %s3058_s3 = inlined_call_operand.vmem [shape: bf16[128,128], index: 3, kind: input, shape index: {}]   ;;  %s3059_s4 = inlined_call_operand.vmem [shape: f32[1,128], index: 4, kind: input, shape index: {}]   ;;  %s3060_s5 = inlined_call_operand.vmem [shape: f32[2,16,16,128], index: 5, kind: output, shape index: {}]  }
   0x1   :  { %s1989_s20 = smov 0  }
   0x2 LB: > { %s27_s21 = sadd.s32 1, %s1949_s19  ;;  %p1686_p0 = scmp.ge.s32.totalorder %s1953_s20, 1  ;;  %s1953_s20 = sphi %s1989_s20, %s15_s20   ;;  %s1949_s19 = sphi %s1987_s19, %s3062_s19   ;;  %s1945_s18 = sphi %s1985_s18, %s3061_s18  }
   0x3   : > { %p29_p1 = scmp.ge.s32.totalorder %s27_s21, 2  ;;  %p201_p2 = scmp.lt.s32.totalorder %s1953_s20, 3 }
   0x5   : > { %s3064_s21 = smov (%p29_p1, %s27_s21), 0  ;;  %p202_p3 = pnand %p1686_p0, %p201_p2 }
   0x6   : > { %v1921_v0 = vld [vmem:[%s3058_s3] sm:$0xff] (!%p202_p3)   ;;  %p234_p4 = scmp.lt.s32.totalorder (!%p202_p3), %s1945_s18, 1  ;;  %v1922_v1 = vld [vmem:[%s3058_s3 + $0x8] sm:$0xff] (!%p202_p3)   ;;  %v271_v2 = vlaneseq (!%p202_p3)  ;;  %v1923_v3 = vld [vmem:[%s3058_s3 + $0x10] sm:$0xff] (!%p202_p3)  }
   0x7   : > { %205 = sbr.rel (%p202_p3) target bundleno = 446 (0x1be), region = 40  ;;  %1832 = vmatprep.subr.bf16.mxu0 (!%p202_p3), %v1921_v0  ;;  %1864 = vmatprep.subr.bf16.mxu1 (!%p202_p3), %v1921_v0  ;;  %v1924_v5 = vld [vmem:[%s3058_s3 + $0x18] sm:$0xff] (!%p202_p3)   ;;  %v251_v6 = vld [vmem:[%s3056_s1] sm:$0xff] (!%p202_p3)  ;;  %v2082_v37 = vld [vmem:[%s3056_s1 + $0x8] ss:$0 sm:$0xff] (!%p202_p3) }
   0x8   : > { %1833 = vmatpush3.bf16.msra.mxu0 (!%p202_p3), %v1921_v0  ;;  %1865 = vmatpush3.bf16.msra.mxu1 (!%p202_p3), %v1921_v0  ;;  %v2015_v4 = vshrl.u32 (!%p202_p3), %v271_v2, 7  ;;  %v1925_v22 = vld [vmem:[%s3058_s3 + $0x20] sm:$0xff] (!%p202_p3)   ;;  %v1926_v42 = vld [vmem:[%s3058_s3 + $0x28] sm:$0xff] (!%p202_p3)   ;;  %v1927_v58 = vld [vmem:[%s3058_s3 + $0x30] sm:$0xff] (!%p202_p3)  }
   0x9   : > { %1834 = vmatprep.subr.bf16.mxu0 (!%p202_p3), %v1922_v1  ;;  %1866 = vmatprep.subr.bf16.mxu1 (!%p202_p3), %v1922_v1 }
   0xa   : > { %v337_v7 = vsub.s32 (!%p202_p3), 1, %v2015_v4  ;;  %v357_v8 = vsub.s32 (!%p202_p3), 4, %v2015_v4  ;;  %v393_v9 = vsub.s32 (!%p202_p3), 7, %v2015_v4  ;;  %v429_v10 = vsub.s32 (!%p202_p3), 0, %v2015_v4 }
   0xb   : > { %v449_v13 = vsub.s32 (!%p202_p3), 3, %v2015_v4  ;;  %v485_v14 = vsub.s32 (!%p202_p3), 6, %v2015_v4  ;;  %v521_v21 = vsub.s32 (!%p202_p3), 2, %v2015_v4  ;;  %v541_v28 = vsub.s32 (!%p202_p3), 5, %v2015_v4 }
   0xc   : > { %1835 = vmatpush3.bf16.msra.mxu0 (!%p202_p3), %v1922_v1  ;;  %1867 = vmatpush3.bf16.msra.mxu1 (!%p202_p3), %v1922_v1  ;;  %v2033_v12 = vrot.slane (!%p202_p3), %v251_v6, %v337_v7  ;;  %v2044_v18 = vrot.slane (!%p202_p3), %v251_v6, %v357_v8  ;;  %v2046_v19 = vrot.slane (!%p202_p3), %v251_v6, %v393_v9  ;;  %v2085_v38 = vadd.s32 (!%p202_p3), 8, %v2015_v4 }
   0xd   : > { %1836 = vmatprep.subr.bf16.mxu0 (!%p202_p3), %v1923_v3  ;;  %1868 = vmatprep.subr.bf16.mxu1 (!%p202_p3), %v1923_v3  ;;  %v2048_v20 = vrot.slane (!%p202_p3), %v251_v6, %v429_v10  ;;  %v2062_v27 = vrot.slane (!%p202_p3), %v251_v6, %v449_v13  ;;  %v2087_v41 = vrot.slane (!%p202_p3), %v251_v6, %v485_v14  ;;  %vm274_vm0 = vcmp.gt.s32.totalorder (!%p202_p3), %v2015_v4, 0 }
   0xe   : > { %s3066_s18 = smov (!%p234_p4, %s1945_s18), 1  ;;  %v2093_v45 = vrot.slane %v251_v6, %v521_v21  ;;  %v2101_v52 = vrot.slane %v251_v6, %v541_v28  ;;  %vm277_vm1 = vcmp.lt.s32.totalorder %v2085_v38, 15  ;;  %vm627_vm2 = vcmp.lt.s32.totalorder %v2015_v4, 1 }
   0xf   : > { %s1896_s28 = smul.u32 288, %s3066_s18  ;;  %vm696_vm3 = vcmp.lt.s32.totalorder %v2015_v4, 7  ;;  %s1799_s8 = sshll.u32 %s3066_s18, 8 }
  0x10   : > { %1837 = vmatpush3.bf16.msra.mxu0 %v1923_v3  ;;  %1869 = vmatpush3.bf16.msra.mxu1 %v1923_v3  ;;  %s2981_s11 = scalar_lea.vmem %s3060_s5, %s1799_s8 }
  0x11   : > { %s2020_s6 = scalar_lea.vmem %s3055_s0, %s1896_s28  ;;  %1838 = vmatprep.subr.bf16.mxu0 %v1924_v5  ;;  %1870 = vmatprep.subr.bf16.mxu1 %v1924_v5 }
  0x12   : > { %v281_v11 = vld [vmem:[%s2020_s6] sm:$0xff]  ;;  %v282_v15 = vld [vmem:[%s2020_s6 + $0x8] sm:$0xff]  ;;  %v2039_v16 = vld [vmem:[%s2020_s6 + $0x10] sm:$0xff] }
  0x13   : > { %v2042_v17 = vld [vmem:[%s2020_s6 + $0x18] sm:$0xff]  ;;  %v2055_v23 = vld [vmem:[%s2020_s6 + $0x20] sm:$0xff]  ;;  %v2058_v24 = vld [vmem:[%s2020_s6 + $0x28] sm:$0xff]  ;;  %v339_v25 = vmul.f32 %v2033_v12, %v281_v11  ;;  %v340_v26 = vmul.f32 %v2033_v12, %v282_v15  ;;  %v359_v29 = vmul.f32 %v2039_v16, %v2044_v18  ;;  %v431_v33 = vmul.f32 %v2048_v20, %v281_v11 }
  0x14   : > { %v360_v30 = vmul.f32 %v2042_v17, %v2044_v18  ;;  %v395_v31 = vmul.f32 %v2055_v23, %v2046_v19  ;;  %v396_v32 = vmul.f32 %v2058_v24, %v2046_v19  ;;  %v432_v34 = vmul.f32 %v2048_v20, %v282_v15  ;;  %1839 = vmatpush3.bf16.msra.mxu0 %v1924_v5  ;;  %v1733_v57 = vld [vmem:[%s2020_s6 + $0x80] sm:$0xff]  ;;  %v1734_v61 = vld [vmem:[%s2020_s6 + $0x88] sm:$0xff]  ;;  %v2119_v62 = vld [vmem:[%s2020_s6 + $0x90] sm:$0xff] }
  0x15   : > { %v451_v35 = vmul.f32 %v2039_v16, %v2062_v27  ;;  %v452_v36 = vmul.f32 %v2042_v17, %v2062_v27  ;;  %1871 = vmatpush3.bf16.msra.mxu1 %v1924_v5  ;;  %v375_v39 = vadd.f32 %v359_v29, %v339_v25  ;;  %1840 = vmatprep.subr.bf16.mxu0 %v1925_v22  ;;  %v2123_v2 = vld [vmem:[%s2020_s6 + $0x98] sm:$0xff]  ;;  %v2126_v3 = vld [vmem:[%s2020_s6 + $0xa0] sm:$0xff]  ;;  %v2146_v28 = vld [vmem:[%s2020_s6 + $0xa8] sm:$0xff] }
  0x16   : > { %v376_v40 = vadd.f32 %v360_v30, %v340_v26  ;;  %1872 = vmatprep.subr.bf16.mxu1 %v1925_v22  ;;  %v487_v48 = vmul.f32 %v2055_v23, %v2087_v41  ;;  %v488_v49 = vmul.f32 %v2058_v24, %v2087_v41  ;;  %v523_v50 = vmul.f32 %v2093_v45, %v281_v11 }
  0x17   : > { %v467_v43 = vadd.f32 %v451_v35, %v431_v33  ;;  %v468_v44 = vadd.f32 %v452_v36, %v432_v34  ;;  %v411_v46 = vadd.f32 %v395_v31, %v375_v39  ;;  %v524_v51 = vmul.f32 %v2093_v45, %v282_v15  ;;  %v1928_v15 = vld [vmem:[%s3058_s3 + $0x38] sm:$0xff]  }
  0x18   : > { %v412_v47 = vadd.f32 %v396_v32, %v376_v40  ;;  %v579_v53 = vmul.f32 %v2082_v37, %v2055_v23  ;;  %1841 = vmatpush3.bf16.msra.mxu0 %v1925_v22  ;;  %v580_v56 = vmul.f32 %v2082_v37, %v2058_v24  ;;  %v543_v59 = vmul.f32 %v2039_v16, %v2101_v52 }
  0x19   : > { %1873 = vmatpush3.bf16.msra.mxu1 %v1925_v22  ;;  %v503_v54 = vadd.f32 %v487_v48, %v467_v43  ;;  %v504_v55 = vadd.f32 %v488_v49, %v468_v44  ;;  %1842 = vmatprep.subr.bf16.mxu0 %v1926_v42  ;;  %v544_v60 = vmul.f32 %v2042_v17, %v2101_v52  ;;  %v2159_v43 = vld [vmem:[%s3057_s2] ss:$0 sm:$0xff] }
  0x1a   : > { %1874 = vmatprep.subr.bf16.mxu1 %v1926_v42  ;;  %v1035_v63 = vmul.f32 %v1733_v57, %v2033_v12  ;;  %v1036_v5 = vmul.f32 %v1734_v61, %v2033_v12  ;;  %v1051_v6 = vmul.f32 %v2119_v62, %v2044_v18  ;;  %v559_v7 = vadd.f32 %v543_v59, %v523_v50 }
  0x1b   : > { %v611_v0 = vrot.slane %v503_v54, 7  ;;  %v619_v1 = vrot.slane %v504_v55, 7  ;;  %v560_v8 = vadd.f32 %v544_v60, %v524_v51  ;;  %v1052_v9 = vmul.f32 %v2123_v2, %v2044_v18 }
  0x1c   : > { %v1083_v10 = vmul.f32 %v2126_v3, %v2046_v19  ;;  %1843 = vmatpush3.bf16.msra.mxu0 %v1926_v42  ;;  %v1067_v14 = vadd.f32 %v1051_v6, %v1035_v63  ;;  %v595_v21 = vadd.f32 %v579_v53, %v559_v7  ;;  %v1084_v31 = vmul.f32 %v2146_v28, %v2046_v19 }
  0x1d   : > { %1875 = vmatpush3.bf16.msra.mxu1 %v1926_v42  ;;  %v628_v11 = vsel %vm627_vm2, %v611_v0, %v619_v1  ;;  %v636_v13 = vsel %vm627_vm2, %v619_v1, %v611_v0  ;;  %1844 = vmatprep.subr.bf16.mxu0 %v1927_v58  ;;  %v596_v22 = vadd.f32 %v580_v56, %v560_v8 }
  0x1e   : > { %1876 = vmatprep.subr.bf16.mxu1 %v1927_v58  ;;  %v648_v25 = vsel %vm274_vm0, %v636_v13, 0.0  ;;  %v665_v26 = vadd.f32 %v628_v11, %v412_v47  ;;  %v1068_v30 = vadd.f32 %v1052_v9, %v1036_v5  ;;  %v1099_v32 = vadd.f32 %v1083_v10, %v1067_v14 }
  0x1f   : > { %v664_v29 = vadd.f32 %v648_v25, %v411_v46  ;;  %v680_v33 = vrot.slane %v595_v21, 1  ;;  %v688_v34 = vrot.slane %v596_v22, 1  ;;  %v1115_v35 = vmul.f32 %v1733_v57, %v2048_v20 }
  0x20   : > { %v1116_v36 = vmul.f32 %v1734_v61, %v2048_v20  ;;  %1845 = vmatpush3.bf16.msra.mxu0 %v1927_v58  ;;  %v1100_v39 = vadd.f32 %v1084_v31, %v1068_v30  ;;  %v1131_v40 = vmul.f32 %v2119_v62, %v2062_v27  ;;  %v1132_v42 = vmul.f32 %v2123_v2, %v2062_v27 }
  0x21   : > { %1877 = vmatpush3.bf16.msra.mxu1 %v1927_v58  ;;  %1846 = vmatprep.subr.bf16.mxu0 %v1928_v15  ;;  %v697_v44 = vsel %vm696_vm3, %v680_v33, %v688_v34  ;;  %v705_v46 = vsel %vm696_vm3, %v688_v34, %v680_v33  ;;  %v1163_v47 = vmul.f32 %v2126_v3, %v2087_v41  ;;  %v2198_v34 = vld [vmem:[%s2020_s6 + $0x30] sm:$0xff] }
  0x22   : > { %1878 = vmatprep.subr.bf16.mxu1 %v1928_v15  ;;  %v718_v48 = vsel %vm277_vm1, %v705_v46, 0.0  ;;  %v733_v49 = vadd.f32 %v697_v44, %v664_v29  ;;  %v1147_v50 = vadd.f32 %v1131_v40, %v1115_v35  ;;  %v1148_v51 = vadd.f32 %v1132_v42, %v1116_v36  ;;  %v2201_v42 = vld [vmem:[%s2020_s6 + $0x38] sm:$0xff] }
  0x23   : > { %v734_v53 = vadd.f32 %v718_v48, %v665_v26  ;;  %v1164_v54 = vmul.f32 %v2146_v28, %v2087_v41  ;;  %v1195_v55 = vmul.f32 %v1733_v57, %v2093_v45  ;;  %v1196_v56 = vmul.f32 %v1734_v61, %v2093_v45 }
  0x24   : > { %1847 = vmatpush3.bf16.msra.mxu0 %v1928_v15  ;;  %v755_v58 = vadd.f32 %v2159_v43, %v733_v49  ;;  %v1179_v59 = vadd.f32 %v1163_v47, %v1147_v50  ;;  %v1211_v60 = vmul.f32 %v2119_v62, %v2101_v52  ;;  %v1212_v1 = vmul.f32 %v2123_v2, %v2101_v52 }
  0x25   : > { %1879 = vmatpush3.bf16.msra.mxu1 %v1928_v15  ;;  %v756_v63 = vadd.f32 %v2159_v43, %v734_v53  ;;  %v1180_v0 = vadd.f32 %v1164_v54, %v1148_v51  ;;  %v1243_v5 = vmul.f32 %v2126_v3, %v2082_v37  ;;  %v1244_v61 = vmul.f32 %v2146_v28, %v2082_v37 }
  0x26   : > { %v771_v57 = vmax.f32 %v755_v58, 0.0  ;;  %v1227_v6 = vadd.f32 %v1211_v60, %v1195_v55  ;;  %v1275_v7 = vrot.slane %v1179_v59, 7  ;;  %v1228_v9 = vadd.f32 %v1212_v1, %v1196_v56 }
  0x27   : > { %v772_v8 = vmax.f32 %v756_v63, 0.0  ;;  %v1283_v10 = vrot.slane %v1180_v0, 7  ;;  %v341_v11 = vmul.f32 %v2039_v16, %v2033_v12  ;;  %v342_v14 = vmul.f32 %v2042_v17, %v2033_v12 }
  0x28   : > { %v1259_v13 = vadd.f32 %v1243_v5, %v1227_v6  ;;  %v361_v15 = vmul.f32 %v2055_v23, %v2044_v18  ;;  %v362_v21 = vmul.f32 %v2058_v24, %v2044_v18  ;;  %v1260_v25 = vadd.f32 %v1244_v61, %v1228_v9 }
  0x29   : > { %v787_v22 = vpack.c.bf16 %v772_v8, %v771_v57  ;;  %v1291_v26 = vsel %vm627_vm2, %v1275_v7, %v1283_v10  ;;  %v1299_v29 = vsel %vm627_vm2, %v1283_v10, %v1275_v7  ;;  %v397_v46 = vmul.f32 %v2198_v34, %v2046_v19 }
  0x2a   : > { %v1307_v30 = vsel %vm274_vm0, %v1299_v29, 0.0  ;;  %v1324_v31 = vadd.f32 %v1291_v26, %v1100_v39  ;;  %v1339_v33 = vrot.slane %v1259_v13, 1  ;;  %v377_v35 = vadd.f32 %v361_v15, %v341_v11 }
  0x2b   : > { %1848 = vmatprep.mubr.bf16.mxu0 %v787_v22  ;;  %v1323_v36 = vadd.f32 %v1307_v30, %v1099_v32  ;;  %v1347_v40 = vrot.slane %v1260_v25, 1  ;;  %v378_v44 = vadd.f32 %v362_v21, %v342_v14  ;;  %v398_v47 = vmul.f32 %v2201_v42, %v2046_v19 }
  0x2c   : > { %v433_v48 = vmul.f32 %v2039_v16, %v2048_v20  ;;  %v434_v39 = vmul.f32 %v2042_v17, %v2048_v20  ;;  %v453_v49 = vmul.f32 %v2055_v23, %v2062_v27  ;;  %v413_v51 = vadd.f32 %v397_v46, %v377_v35  ;;  %v2252_v46 = vld [vmem:[%s2020_s6 + $0xb0] sm:$0xff] }
  0x2d   : > { %v1355_v32 = vsel %vm696_vm3, %v1339_v33, %v1347_v40  ;;  %v1363_v50 = vsel %vm696_vm3, %v1347_v40, %v1339_v33  ;;  %v454_v53 = vmul.f32 %v2058_v24, %v2062_v27  ;;  %v414_v56 = vadd.f32 %v398_v47, %v378_v44 }
  0x2e   : > { %v1372_v54 = vsel %vm277_vm1, %v1363_v50, 0.0  ;;  %v1387_v55 = vadd.f32 %v1355_v32, %v1323_v36  ;;  %v469_v58 = vadd.f32 %v453_v49, %v433_v48  ;;  %v489_v63 = vmul.f32 %v2198_v34, %v2087_v41  ;;  %v2257_v49 = vld [vmem:[%s2020_s6 + $0xb8] sm:$0xff] }
  0x2f   : > { %v1388_v59 = vadd.f32 %v1372_v54, %v1324_v31  ;;  %v470_v60 = vadd.f32 %v454_v53, %v434_v39  ;;  %v490_v0 = vmul.f32 %v2201_v42, %v2087_v41  ;;  %v525_v5 = vmul.f32 %v2039_v16, %v2093_v45 }
  0x30   : > { %v1403_v1 = vadd.f32 %v2159_v43, %v1387_v55  ;;  %v526_v57 = vmul.f32 %v2042_v17, %v2093_v45  ;;  %v545_v6 = vmul.f32 %v2055_v23, %v2101_v52  ;;  %v505_v7 = vadd.f32 %v489_v63, %v469_v58 }
  0x31   : > { %v1404_v61 = vadd.f32 %v2159_v43, %v1388_v59  ;;  %v506_v8 = vadd.f32 %v490_v0, %v470_v60  ;;  %v546_v9 = vmul.f32 %v2058_v24, %v2101_v52  ;;  %v581_v13 = vmul.f32 %v2082_v37, %v2198_v34 }
  0x32   : > { %v1419_v10 = vmax.f32 %v1403_v1, 0.0  ;;  %v561_v11 = vadd.f32 %v545_v6, %v525_v5  ;;  %v582_v16 = vmul.f32 %v2082_v37, %v2201_v42  ;;  %v612_v15 = vrot.slane %v505_v7, 7 }
  0x33   : > { %v1420_v17 = vmax.f32 %v1404_v61, 0.0  ;;  %v562_v14 = vadd.f32 %v546_v9, %v526_v57  ;;  %v620_v21 = vrot.slane %v506_v8, 7  ;;  %v1037_v25 = vmul.f32 %v2119_v62, %v2033_v12 }
  0x34   : > { %v597_v22 = vadd.f32 %v581_v13, %v561_v11  ;;  %v1038_v26 = vmul.f32 %v2123_v2, %v2033_v12  ;;  %v1053_v29 = vmul.f32 %v2126_v3, %v2044_v18  ;;  %v1054_v47 = vmul.f32 %v2146_v28, %v2044_v18 }
  0x35   : > { %v1435_v30 = vpack.c.bf16 %v1420_v17, %v1419_v10  ;;  %v598_v31 = vadd.f32 %v582_v16, %v562_v14  ;;  %v629_v33 = vsel %vm627_vm2, %v612_v15, %v620_v21  ;;  %v637_v35 = vsel %vm627_vm2, %v620_v21, %v612_v15 }
  0x36   : > { %v650_v36 = vsel %vm274_vm0, %v637_v35, 0.0  ;;  %v667_v40 = vadd.f32 %v629_v33, %v414_v56  ;;  %v681_v44 = vrot.slane %v597_v22, 1  ;;  %v1069_v32 = vadd.f32 %v1053_v29, %v1037_v25 }
  0x37   : > { %1880 = vmatprep.mubr.bf16.mxu1 %v1435_v30  ;;  %v666_v48 = vadd.f32 %v650_v36, %v413_v51  ;;  %v689_v39 = vrot.slane %v598_v31, 1  ;;  %v1085_v50 = vmul.f32 %v2252_v46, %v2046_v19  ;;  %v1070_v53 = vadd.f32 %v1054_v47, %v1038_v26  ;;  %v2302_v47 = vld [vmem:[%s2020_s6 + $0x40] sm:$0xff] }
  0x38   : > { %v1086_v54 = vmul.f32 %v2257_v49, %v2046_v19  ;;  %v1117_v55 = vmul.f32 %v2119_v62, %v2048_v20  ;;  %v1118_v56 = vmul.f32 %v2123_v2, %v2048_v20  ;;  %v1133_v60 = vmul.f32 %v2126_v3, %v2062_v27 }
  0x39   : > { %v698_v51 = vsel %vm696_vm3, %v681_v44, %v689_v39  ;;  %v706_v58 = vsel %vm696_vm3, %v689_v39, %v681_v44  ;;  %v1101_v59 = vadd.f32 %v1085_v50, %v1069_v32  ;;  %v1134_v5 = vmul.f32 %v2146_v28, %v2062_v27 }
  0x3a   : > { %v720_v63 = vsel %vm277_vm1, %v706_v58, 0.0  ;;  %v735_v0 = vadd.f32 %v698_v51, %v666_v48  ;;  %v1102_v1 = vadd.f32 %v1086_v54, %v1070_v53  ;;  %v1149_v6 = vadd.f32 %v1133_v60, %v1117_v55  ;;  %v2315_v58 = vld [vmem:[%s2020_s6 + $0x48] sm:$0xff] }
  0x3b   : > { %v736_v57 = vadd.f32 %v720_v63, %v667_v40  ;;  %v1165_v61 = vmul.f32 %v2252_v46, %v2087_v41  ;;  %v1166_v7 = vmul.f32 %v2257_v49, %v2087_v41  ;;  %v1150_v9 = vadd.f32 %v1134_v5, %v1118_v56 }
  0x3c   : > { %v757_v8 = vadd.f32 %v2159_v43, %v735_v0  ;;  %v1197_v10 = vmul.f32 %v2119_v62, %v2093_v45  ;;  %v1198_v11 = vmul.f32 %v2123_v2, %v2093_v45  ;;  %v1213_v17 = vmul.f32 %v2126_v3, %v2101_v52 }
  0x3d   : > { %v758_v13 = vadd.f32 %v2159_v43, %v736_v57  ;;  %v1181_v16 = vadd.f32 %v1165_v61, %v1149_v6  ;;  %v1214_v14 = vmul.f32 %v2146_v28, %v2101_v52  ;;  %v1182_v21 = vadd.f32 %v1166_v7, %v1150_v9 }
  0x3e   : > { %v773_v15 = vmax.f32 %v757_v8, 0.0  ;;  %v1245_v22 = vmul.f32 %v2252_v46, %v2082_v37  ;;  %v1246_v62 = vmul.f32 %v2257_v49, %v2082_v37  ;;  %v1229_v2 = vadd.f32 %v1213_v17, %v1197_v10 }
  0x3f   : > { %v774_v25 = vmax.f32 %v758_v13, 0.0  ;;  %v1230_v26 = vadd.f32 %v1214_v14, %v1198_v11  ;;  %v1276_v29 = vrot.slane %v1181_v16, 7  ;;  %v1284_v30 = vrot.slane %v1182_v21, 7 }
  0x40   : > { %v343_v31 = vmul.f32 %v2055_v23, %v2033_v12  ;;  %v344_v33 = vmul.f32 %v2058_v24, %v2033_v12  ;;  %v363_v35 = vmul.f32 %v2198_v34, %v2044_v18  ;;  %v1261_v40 = vadd.f32 %v1245_v22, %v1229_v2 }
  0x41   : > { %v788_v36 = vpack.c.bf16 %v774_v25, %v773_v15  ;;  %v1262_v44 = vadd.f32 %v1246_v62, %v1230_v26  ;;  %v364_v48 = vmul.f32 %v2201_v42, %v2044_v18  ;;  %v1292_v39 = vsel %vm627_vm2, %v1276_v29, %v1284_v30 }
  0x42   : > { %v1300_v32 = vsel %vm627_vm2, %v1284_v30, %v1276_v29  ;;  %v379_v50 = vadd.f32 %v363_v35, %v343_v31  ;;  %v399_v53 = vmul.f32 %v2302_v47, %v2046_v19  ;;  %v1326_v55 = vadd.f32 %v1292_v39, %v1102_v1 }
  0x43   : > { %1849 = vmatmul.mubr.bf16.vlgmr.msra.gmra.mrb[0].mxu0 %v788_v36  ;;  %v1309_v54 = vsel %vm274_vm0, %v1300_v32, 0.0  ;;  %v1340_v56 = vrot.slane %v1261_v40, 1  ;;  %v1348_v51 = vrot.slane %v1262_v44, 1  ;;  %v380_v63 = vadd.f32 %v364_v48, %v344_v33 }
  0x44   : > { %v1325_v60 = vadd.f32 %v1309_v54, %v1101_v59  ;;  %v400_v0 = vmul.f32 %v2315_v58, %v2046_v19  ;;  %v415_v5 = vadd.f32 %v399_v53, %v379_v50  ;;  %v435_v61 = vmul.f32 %v2055_v23, %v2048_v20  ;;  %v2358_v54 = vld [vmem:[%s2020_s6 + $0xc0] sm:$0xff] }
  0x45   : > { %v1356_v57 = vsel %vm696_vm3, %v1340_v56, %v1348_v51  ;;  %v1364_v6 = vsel %vm696_vm3, %v1348_v51, %v1340_v56  ;;  %v436_v1 = vmul.f32 %v2058_v24, %v2048_v20  ;;  %v455_v9 = vmul.f32 %v2198_v34, %v2062_v27 }
  0x46   : > { %v1374_v59 = vsel %vm277_vm1, %v1364_v6, 0.0  ;;  %v1389_v7 = vadd.f32 %v1356_v57, %v1325_v60  ;;  %v416_v8 = vadd.f32 %v400_v0, %v380_v63  ;;  %v456_v11 = vmul.f32 %v2201_v42, %v2062_v27 }
  0x47   : > { %v1390_v10 = vadd.f32 %v1374_v59, %v1326_v55  ;;  %v491_v13 = vmul.f32 %v2302_v47, %v2087_v41  ;;  %v492_v16 = vmul.f32 %v2315_v58, %v2087_v41  ;;  %v471_v14 = vadd.f32 %v455_v9, %v435_v61  ;;  %v2361_v55 = vld [vmem:[%s2020_s6 + $0xc8] sm:$0xff] }
  0x48   : > { %v1405_v17 = vadd.f32 %v2159_v43, %v1389_v7  ;;  %v527_v15 = vmul.f32 %v2055_v23, %v2093_v45  ;;  %v528_v21 = vmul.f32 %v2058_v24, %v2093_v45  ;;  %v472_v62 = vadd.f32 %v456_v11, %v436_v1 }
  0x49   : > { %v1406_v22 = vadd.f32 %v2159_v43, %v1390_v10  ;;  %v547_v25 = vmul.f32 %v2198_v34, %v2101_v52  ;;  %v548_v2 = vmul.f32 %v2201_v42, %v2101_v52  ;;  %v507_v29 = vadd.f32 %v491_v13, %v471_v14 }
  0x4a   : > { %v1421_v26 = vmax.f32 %v1405_v17, 0.0  ;;  %v583_v30 = vmul.f32 %v2082_v37, %v2302_v47  ;;  %v584_v23 = vmul.f32 %v2082_v37, %v2315_v58  ;;  %v508_v31 = vadd.f32 %v492_v16, %v472_v62 }
  0x4b   : > { %v1422_v24 = vmax.f32 %v1406_v22, 0.0  ;;  %v563_v33 = vadd.f32 %v547_v25, %v527_v15  ;;  %v564_v35 = vadd.f32 %v548_v2, %v528_v21  ;;  %v613_v36 = vrot.slane %v507_v29, 7 }
  0x4c   : > { %v1039_v40 = vmul.f32 %v2126_v3, %v2033_v12  ;;  %v1040_v44 = vmul.f32 %v2146_v28, %v2033_v12  ;;  %v1055_v48 = vmul.f32 %v2252_v46, %v2044_v18  ;;  %v621_v53 = vrot.slane %v508_v31, 7 }
  0x4d   : > { %v1436_v39 = vpack.c.bf16 %v1422_v24, %v1421_v26  ;;  %v599_v32 = vadd.f32 %v583_v30, %v563_v33  ;;  %v600_v50 = vadd.f32 %v584_v23, %v564_v35  ;;  %v1056_v56 = vmul.f32 %v2257_v49, %v2044_v18 }
  0x4e   : > { %v1071_v51 = vadd.f32 %v1055_v48, %v1039_v40  ;;  %v1087_v60 = vmul.f32 %v2358_v54, %v2046_v19  ;;  %v1088_v63 = vmul.f32 %v2361_v55, %v2046_v19  ;;  %v630_v0 = vsel %vm627_vm2, %v613_v36, %v621_v53 }
  0x4f   : > { %1881 = vmatmul.mubr.bf16.vlgmr.msra.gmra.mrb[0].mxu1 %v1436_v39  ;;  %v638_v57 = vsel %vm627_vm2, %v621_v53, %v613_v36  ;;  %v682_v6 = vrot.slane %v599_v32, 1  ;;  %v690_v61 = vrot.slane %v600_v50, 1  ;;  %v669_v59 = vadd.f32 %v630_v0, %v416_v8  ;;  %v2415_v0 = vld [vmem:[%s2020_s6 + $0x58] sm:$0xff] }
  0x50   : > { %v652_v1 = vsel %vm274_vm0, %v638_v57, 0.0  ;;  %v1072_v7 = vadd.f32 %v1056_v56, %v1040_v44  ;;  %v1103_v9 = vadd.f32 %v1087_v60, %v1071_v51  ;;  %v1119_v16 = vmul.f32 %v2126_v3, %v2048_v20 }
  0x51   : > { %v668_v10 = vadd.f32 %v652_v1, %v415_v5  ;;  %v699_v11 = vsel %vm696_vm3, %v682_v6, %v690_v61  ;;  %v707_v13 = vsel %vm696_vm3, %v690_v61, %v682_v6  ;;  %v1120_v15 = vmul.f32 %v2146_v28, %v2048_v20 }
  0x52   : > { %v722_v17 = vsel %vm277_vm1, %v707_v13, 0.0  ;;  %v1104_v14 = vadd.f32 %v1088_v63, %v1072_v7  ;;  %v1135_v8 = vmul.f32 %v2252_v46, %v2062_v27  ;;  %v1136_v22 = vmul.f32 %v2257_v49, %v2062_v27  ;;  %v2412_v63 = vld [vmem:[%s2020_s6 + $0x50] sm:$0xff] }
  0x53   : > { %v737_v5 = vadd.f32 %v699_v11, %v668_v10  ;;  %v738_v21 = vadd.f32 %v722_v17, %v669_v59  ;;  %v1167_v62 = vmul.f32 %v2358_v54, %v2087_v41  ;;  %v1168_v2 = vmul.f32 %v2361_v55, %v2087_v41 }
  0x54   : > { %v1151_v25 = vadd.f32 %v1135_v8, %v1119_v16  ;;  %v1199_v26 = vmul.f32 %v2126_v3, %v2093_v45  ;;  %v1200_v29 = vmul.f32 %v2146_v28, %v2093_v45  ;;  %v1152_v24 = vadd.f32 %v1136_v22, %v1120_v15 }
  0x55   : > { %v759_v30 = vadd.f32 %v2159_v43, %v737_v5  ;;  %v760_v23 = vadd.f32 %v2159_v43, %v738_v21  ;;  %v1215_v31 = vmul.f32 %v2252_v46, %v2101_v52  ;;  %v1216_v35 = vmul.f32 %v2257_v49, %v2101_v52 }
  0x56   : > { %v1183_v33 = vadd.f32 %v1167_v62, %v1151_v25  ;;  %v1247_v3 = vmul.f32 %v2358_v54, %v2082_v37  ;;  %v1248_v28 = vmul.f32 %v2361_v55, %v2082_v37  ;;  %v1184_v44 = vadd.f32 %v1168_v2, %v1152_v24 }
  0x57   : > { %v775_v36 = vmax.f32 %v759_v30, 0.0  ;;  %v776_v40 = vmax.f32 %v760_v23, 0.0  ;;  %v1231_v48 = vadd.f32 %v1215_v31, %v1199_v26  ;;  %v1232_v39 = vadd.f32 %v1216_v35, %v1200_v29 }
  0x58   : > { %v1277_v32 = vrot.slane %v1183_v33, 7  ;;  %v345_v50 = vmul.f32 %v2198_v34, %v2033_v12  ;;  %v346_v53 = vmul.f32 %v2201_v42, %v2033_v12  ;;  %v1285_v60 = vrot.slane %v1184_v44, 7 }
  0x59   : > { %v789_v56 = vpack.c.bf16 %v776_v40, %v775_v36  ;;  %v1263_v51 = vadd.f32 %v1247_v3, %v1231_v48  ;;  %v365_v57 = vmul.f32 %v2302_v47, %v2044_v18  ;;  %v1264_v6 = vadd.f32 %v1248_v28, %v1232_v39 }
  0x5a   : > { %v366_v61 = vmul.f32 %v2315_v58, %v2044_v18  ;;  %v401_v1 = vmul.f32 %v2412_v63, %v2046_v19  ;;  %v402_v59 = vmul.f32 %v2415_v0, %v2046_v19  ;;  %v1293_v7 = vsel %vm627_vm2, %v1277_v32, %v1285_v60 }
  0x5b   : > { %1852 = vmatprep.mubr.bf16.mxu0 %v789_v56  ;;  %v1301_v10 = vsel %vm627_vm2, %v1285_v60, %v1277_v32  ;;  %v1341_v11 = vrot.slane %v1263_v51, 1  ;;  %v381_v13 = vadd.f32 %v365_v57, %v345_v50  ;;  %v1328_v17 = vadd.f32 %v1293_v7, %v1104_v14 }
  0x5c   : > { %v1311_v16 = vsel %vm274_vm0, %v1301_v10, 0.0  ;;  %v1349_v15 = vrot.slane %v1264_v6, 1  ;;  %v382_v8 = vadd.f32 %v366_v61, %v346_v53  ;;  %v437_v22 = vmul.f32 %v2198_v34, %v2048_v20 }
  0x5d   : > { %v1327_v5 = vadd.f32 %v1311_v16, %v1103_v9  ;;  %v417_v21 = vadd.f32 %v401_v1, %v381_v13  ;;  %v438_v62 = vmul.f32 %v2201_v42, %v2048_v20  ;;  %v457_v14 = vmul.f32 %v2302_v47, %v2062_v27  ;;  %v2466_v1 = vld [vmem:[%s2020_s6 + $0xd0] sm:$0xff] }
  0x5e   : > { %v1357_v25 = vsel %vm696_vm3, %v1341_v11, %v1349_v15  ;;  %v1365_v2 = vsel %vm696_vm3, %v1349_v15, %v1341_v11  ;;  %v418_v26 = vadd.f32 %v402_v59, %v382_v8  ;;  %v458_v30 = vmul.f32 %v2315_v58, %v2062_v27 }
  0x5f   : > { %v1376_v9 = vsel %vm277_vm1, %v1365_v2, 0.0  ;;  %v1391_v29 = vadd.f32 %v1357_v25, %v1327_v5  ;;  %v493_v23 = vmul.f32 %v2412_v63, %v2087_v41  ;;  %v473_v31 = vadd.f32 %v457_v14, %v437_v22  ;;  %v2483_v2 = vld [vmem:[%s2020_s6 + $0xd8] sm:$0xff] }
  0x60   : > { %v1392_v24 = vadd.f32 %v1376_v9, %v1328_v17  ;;  %v494_v33 = vmul.f32 %v2415_v0, %v2087_v41  ;;  %v529_v35 = vmul.f32 %v2198_v34, %v2093_v45  ;;  %v474_v28 = vadd.f32 %v458_v30, %v438_v62 }
  0x61   : > { %v1407_v3 = vadd.f32 %v2159_v43, %v1391_v29  ;;  %v530_v36 = vmul.f32 %v2201_v42, %v2093_v45  ;;  %v549_v40 = vmul.f32 %v2302_v47, %v2101_v52  ;;  %v509_v48 = vadd.f32 %v493_v23, %v473_v31 }
  0x62   : > { %v1408_v44 = vadd.f32 %v2159_v43, %v1392_v24  ;;  %v550_v39 = vmul.f32 %v2315_v58, %v2101_v52  ;;  %v585_v32 = vmul.f32 %v2082_v37, %v2412_v63  ;;  %v510_v50 = vadd.f32 %v494_v33, %v474_v28 }
  0x63   : > { %v1423_v34 = vmax.f32 %v1407_v3, 0.0  ;;  %v565_v53 = vadd.f32 %v549_v40, %v529_v35  ;;  %v586_v56 = vmul.f32 %v2082_v37, %v2415_v0  ;;  %v614_v60 = vrot.slane %v509_v48, 7 }
  0x64   : > { %v1424_v42 = vmax.f32 %v1408_v44, 0.0  ;;  %v566_v51 = vadd.f32 %v550_v39, %v530_v36  ;;  %v1041_v57 = vmul.f32 %v2252_v46, %v2033_v12  ;;  %v622_v61 = vrot.slane %v510_v50, 7 }
  0x65   : > { %v601_v6 = vadd.f32 %v585_v32, %v565_v53  ;;  %v1042_v59 = vmul.f32 %v2257_v49, %v2033_v12  ;;  %v1057_v7 = vmul.f32 %v2358_v54, %v2044_v18  ;;  %v1058_v13 = vmul.f32 %v2361_v55, %v2044_v18 }
  0x66   : > { %v1437_v10 = vpack.c.bf16 %v1424_v42, %v1423_v34  ;;  %v602_v11 = vadd.f32 %v586_v56, %v566_v51  ;;  %v1089_v16 = vmul.f32 %v2466_v1, %v2046_v19  ;;  %v631_v17 = vsel %vm627_vm2, %v614_v60, %v622_v61 }
  0x67   : > { %v639_v15 = vsel %vm627_vm2, %v622_v61, %v614_v60  ;;  %v683_v8 = vrot.slane %v601_v6, 1  ;;  %v1073_v5 = vadd.f32 %v1057_v7, %v1041_v57  ;;  %v671_v62 = vadd.f32 %v631_v17, %v418_v26 }
  0x68   : > { %1884 = vmatprep.mubr.bf16.mxu1 %v1437_v10  ;;  %v654_v22 = vsel %vm274_vm0, %v639_v15, 0.0  ;;  %v691_v25 = vrot.slane %v602_v11, 1  ;;  %v1074_v14 = vadd.f32 %v1058_v13, %v1042_v59  ;;  %v1090_v29 = vmul.f32 %v2483_v2, %v2046_v19 }
  0x69   : > { %v670_v9 = vadd.f32 %v654_v22, %v417_v21  ;;  %v1105_v30 = vadd.f32 %v1089_v16, %v1073_v5  ;;  %v1121_v23 = vmul.f32 %v2252_v46, %v2048_v20  ;;  %v1122_v26 = vmul.f32 %v2257_v49, %v2048_v20  ;;  %v2526_v5 = vld [vmem:[%s2020_s6 + $0x60] sm:$0xff] }
  0x6a   : > { %v700_v24 = vsel %vm696_vm3, %v683_v8, %v691_v25  ;;  %v708_v31 = vsel %vm696_vm3, %v691_v25, %v683_v8  ;;  %v1137_v33 = vmul.f32 %v2358_v54, %v2062_v27  ;;  %v1106_v3 = vadd.f32 %v1090_v29, %v1074_v14 }
  0x6b   : > { %v724_v21 = vsel %vm277_vm1, %v708_v31, 0.0  ;;  %v739_v35 = vadd.f32 %v700_v24, %v670_v9  ;;  %v1138_v28 = vmul.f32 %v2361_v55, %v2062_v27  ;;  %v1169_v44 = vmul.f32 %v2466_v1, %v2087_v41 }
  0x6c   : > { %v740_v36 = vadd.f32 %v724_v21, %v671_v62  ;;  %v1153_v40 = vadd.f32 %v1137_v33, %v1121_v23  ;;  %v1170_v48 = vmul.f32 %v2483_v2, %v2087_v41  ;;  %v1201_v34 = vmul.f32 %v2252_v46, %v2093_v45 }
  0x6d   : > { %v761_v39 = vadd.f32 %v2159_v43, %v739_v35  ;;  %v1154_v32 = vadd.f32 %v1138_v28, %v1122_v26  ;;  %v1202_v50 = vmul.f32 %v2257_v49, %v2093_v45  ;;  %v1217_v42 = vmul.f32 %v2358_v54, %v2101_v52  ;;  %v2539_v26 = vld [vmem:[%s2020_s6 + $0x68] sm:$0xff] }
  0x6e   : > { %v762_v53 = vadd.f32 %v2159_v43, %v740_v36  ;;  %v1185_v56 = vadd.f32 %v1169_v44, %v1153_v40  ;;  %v1218_v51 = vmul.f32 %v2361_v55, %v2101_v52  ;;  %v1249_v6 = vmul.f32 %v2466_v1, %v2082_v37 }
  0x6f   : > { %v777_v60 = vmax.f32 %v761_v39, 0.0  ;;  %v1186_v57 = vadd.f32 %v1170_v48, %v1154_v32  ;;  %v1250_v46 = vmul.f32 %v2483_v2, %v2082_v37  ;;  %v1233_v49 = vadd.f32 %v1217_v42, %v1201_v34 }
  0x70   : > { %v778_v61 = vmax.f32 %v762_v53, 0.0  ;;  %v1234_v59 = vadd.f32 %v1218_v51, %v1202_v50  ;;  %v1278_v7 = vrot.slane %v1185_v56, 7  ;;  %v347_v11 = vmul.f32 %v2302_v47, %v2033_v12 }
  0x71   : > { %v1286_v10 = vrot.slane %v1186_v57, 7  ;;  %v348_v13 = vmul.f32 %v2315_v58, %v2033_v12  ;;  %v367_v16 = vmul.f32 %v2412_v63, %v2044_v18  ;;  %v1265_v15 = vadd.f32 %v1249_v6, %v1233_v49 }
  0x72   : > { %v790_v17 = vpack.c.bf16 %v778_v61, %v777_v60  ;;  %v1266_v8 = vadd.f32 %v1250_v46, %v1234_v59  ;;  %v368_v22 = vmul.f32 %v2415_v0, %v2044_v18  ;;  %v403_v9 = vmul.f32 %v2526_v5, %v2046_v19 }
  0x73   : > { %v1294_v62 = vsel %vm627_vm2, %v1278_v7, %v1286_v10  ;;  %v1302_v25 = vsel %vm627_vm2, %v1286_v10, %v1278_v7  ;;  %v383_v14 = vadd.f32 %v367_v16, %v347_v11  ;;  %v1342_v24 = vrot.slane %v1265_v15, 1 }
  0x74   : > { %1853 = vmatmul.mubr.bf16.gmra.mrb[4].mxu0 %v790_v17  ;;  %v1313_v29 = vsel %vm274_vm0, %v1302_v25, 0.0  ;;  %v1330_v23 = vadd.f32 %v1294_v62, %v1106_v3  ;;  %v1350_v31 = vrot.slane %v1266_v8, 1  ;;  %v384_v21 = vadd.f32 %v368_v22, %v348_v13 }
  0x75   : > { %v1329_v33 = vadd.f32 %v1313_v29, %v1105_v30  ;;  %v404_v35 = vmul.f32 %v2539_v26, %v2046_v19  ;;  %v419_v28 = vadd.f32 %v403_v9, %v383_v14  ;;  %v439_v44 = vmul.f32 %v2302_v47, %v2048_v20  ;;  %v2582_v29 = vld [vmem:[%s2020_s6 + $0xe0] sm:$0xff] }
  0x76   : > { %v1358_v36 = vsel %vm696_vm3, %v1342_v24, %v1350_v31  ;;  %v1366_v40 = vsel %vm696_vm3, %v1350_v31, %v1342_v24  ;;  %v440_v3 = vmul.f32 %v2315_v58, %v2048_v20  ;;  %v459_v32 = vmul.f32 %v2412_v63, %v2062_v27 }
  0x77   : > { %v1378_v30 = vsel %vm277_vm1, %v1366_v40, 0.0  ;;  %v1393_v48 = vadd.f32 %v1358_v36, %v1329_v33  ;;  %v420_v39 = vadd.f32 %v404_v35, %v384_v21  ;;  %v460_v50 = vmul.f32 %v2415_v0, %v2062_v27 }
  0x78   : > { %v1394_v34 = vadd.f32 %v1378_v30, %v1330_v23  ;;  %v495_v53 = vmul.f32 %v2526_v5, %v2087_v41  ;;  %v496_v56 = vmul.f32 %v2539_v26, %v2087_v41  ;;  %v475_v51 = vadd.f32 %v459_v32, %v439_v44  ;;  %v2585_v23 = vld [vmem:[%s2020_s6 + $0xe8] sm:$0xff] }
  0x79   : > { %v1409_v42 = vadd.f32 %v2159_v43, %v1393_v48  ;;  %v531_v60 = vmul.f32 %v2302_v47, %v2093_v45  ;;  %v532_v57 = vmul.f32 %v2315_v58, %v2093_v45  ;;  %v476_v46 = vadd.f32 %v460_v50, %v440_v3 }
  0x7a   : > { %v1410_v6 = vadd.f32 %v2159_v43, %v1394_v34  ;;  %v551_v61 = vmul.f32 %v2412_v63, %v2101_v52  ;;  %v552_v49 = vmul.f32 %v2415_v0, %v2101_v52  ;;  %v511_v7 = vadd.f32 %v495_v53, %v475_v51 }
  0x7b   : > { %v1425_v59 = vmax.f32 %v1409_v42, 0.0  ;;  %v587_v10 = vmul.f32 %v2082_v37, %v2526_v5  ;;  %v588_v47 = vmul.f32 %v2082_v37, %v2539_v26  ;;  %v512_v11 = vadd.f32 %v496_v56, %v476_v46 }
  0x7c   : > { %v1426_v58 = vmax.f32 %v1410_v6, 0.0  ;;  %v567_v13 = vadd.f32 %v551_v61, %v531_v60  ;;  %v568_v16 = vadd.f32 %v552_v49, %v532_v57  ;;  %v615_v17 = vrot.slane %v511_v7, 7 }
  0x7d   : > { %v1043_v15 = vmul.f32 %v2358_v54, %v2033_v12  ;;  %v1044_v8 = vmul.f32 %v2361_v55, %v2033_v12  ;;  %v1059_v22 = vmul.f32 %v2466_v1, %v2044_v18  ;;  %v623_v9 = vrot.slane %v512_v11, 7 }
  0x7e   : > { %v1438_v62 = vpack.c.bf16 %v1426_v58, %v1425_v59  ;;  %v603_v25 = vadd.f32 %v587_v10, %v567_v13  ;;  %v604_v14 = vadd.f32 %v588_v47, %v568_v16  ;;  %v1060_v24 = vmul.f32 %v2483_v2, %v2044_v18 }
  0x7f   : > { %v1075_v31 = vadd.f32 %v1059_v22, %v1043_v15  ;;  %v1091_v33 = vmul.f32 %v2582_v29, %v2046_v19  ;;  %v1092_v21 = vmul.f32 %v2585_v23, %v2046_v19  ;;  %v632_v35 = vsel %vm627_vm2, %v615_v17, %v623_v9 }
  0x80   : > { %1885 = vmatmul.mubr.bf16.gmra.mrb[4].mxu1 %v1438_v62  ;;  %v640_v36 = vsel %vm627_vm2, %v623_v9, %v615_v17  ;;  %v684_v40 = vrot.slane %v603_v25, 1  ;;  %v692_v44 = vrot.slane %v604_v14, 1  ;;  %v673_v30 = vadd.f32 %v632_v35, %v420_v39  ;;  %v2639_v35 = vld [vmem:[%s2020_s6 + $0x78] sm:$0xff] }
  0x81   : > { %v656_v3 = vsel %vm274_vm0, %v640_v36, 0.0  ;;  %v1076_v48 = vadd.f32 %v1060_v24, %v1044_v8  ;;  %v1107_v32 = vadd.f32 %v1091_v33, %v1075_v31  ;;  %v1123_v56 = vmul.f32 %v2358_v54, %v2048_v20 }
  0x82   : > { %v672_v34 = vadd.f32 %v656_v3, %v419_v28  ;;  %v701_v50 = vsel %vm696_vm3, %v684_v40, %v692_v44  ;;  %v709_v53 = vsel %vm696_vm3, %v692_v44, %v684_v40  ;;  %v1124_v60 = vmul.f32 %v2361_v55, %v2048_v20 }
  0x83   : > { %v726_v42 = vsel %vm277_vm1, %v709_v53, 0.0  ;;  %v1108_v51 = vadd.f32 %v1092_v21, %v1076_v48  ;;  %v1139_v39 = vmul.f32 %v2466_v1, %v2062_v27  ;;  %v1140_v6 = vmul.f32 %v2483_v2, %v2062_v27  ;;  %v2636_v21 = vld [vmem:[%s2020_s6 + $0x70] sm:$0xff] }
  0x84   : > { %v741_v28 = vadd.f32 %v701_v50, %v672_v34  ;;  %v742_v57 = vadd.f32 %v726_v42, %v673_v30  ;;  %v1171_v46 = vmul.f32 %v2582_v29, %v2087_v41  ;;  %v1172_v49 = vmul.f32 %v2585_v23, %v2087_v41 }
  0x85   : > { %v1155_v61 = vadd.f32 %v1139_v39, %v1123_v56  ;;  %v1203_v59 = vmul.f32 %v2358_v54, %v2093_v45  ;;  %v1204_v7 = vmul.f32 %v2361_v55, %v2093_v45  ;;  %v1156_v58 = vadd.f32 %v1140_v6, %v1124_v60 }
  0x86   : > { %v763_v10 = vadd.f32 %v2159_v43, %v741_v28  ;;  %v764_v47 = vadd.f32 %v2159_v43, %v742_v57  ;;  %v1219_v11 = vmul.f32 %v2466_v1, %v2101_v52  ;;  %v1220_v16 = vmul.f32 %v2483_v2, %v2101_v52 }
  0x87   : > { %v1187_v13 = vadd.f32 %v1171_v46, %v1155_v61  ;;  %v1251_v54 = vmul.f32 %v2582_v29, %v2082_v37  ;;  %v1252_v55 = vmul.f32 %v2585_v23, %v2082_v37  ;;  %v1188_v8 = vadd.f32 %v1172_v49, %v1156_v58 }
  0x88   : > { %v779_v17 = vmax.f32 %v763_v10, 0.0  ;;  %v780_v15 = vmax.f32 %v764_v47, 0.0  ;;  %v1235_v22 = vadd.f32 %v1219_v11, %v1203_v59  ;;  %v1236_v62 = vadd.f32 %v1220_v16, %v1204_v7 }
  0x89   : > { %v1279_v25 = vrot.slane %v1187_v13, 7  ;;  %v349_v14 = vmul.f32 %v2412_v63, %v2033_v12  ;;  %v350_v9 = vmul.f32 %v2415_v0, %v2033_v12  ;;  %v1287_v33 = vrot.slane %v1188_v8, 7 }
  0x8a   : > { %v791_v24 = vpack.c.bf16 %v780_v15, %v779_v17  ;;  %v1267_v31 = vadd.f32 %v1251_v54, %v1235_v22  ;;  %v369_v37 = vmul.f32 %v2526_v5, %v2044_v18  ;;  %v1268_v36 = vadd.f32 %v1252_v55, %v1236_v62 }
  0x8b   : > { %v370_v40 = vmul.f32 %v2539_v26, %v2044_v18  ;;  %v405_v44 = vmul.f32 %v2636_v21, %v2046_v19  ;;  %v406_v3 = vmul.f32 %v2639_v35, %v2046_v19  ;;  %v1295_v30 = vsel %vm627_vm2, %v1279_v25, %v1287_v33 }
  0x8c   : > { %1856 = vmatprep.mubr.bf16.mxu0 %v791_v24  ;;  %v1303_v48 = vsel %vm627_vm2, %v1287_v33, %v1279_v25  ;;  %v1343_v34 = vrot.slane %v1267_v31, 1  ;;  %v385_v50 = vadd.f32 %v369_v37, %v349_v14  ;;  %v1332_v56 = vadd.f32 %v1295_v30, %v1108_v51 }
  0x8d   : > { %v1315_v53 = vsel %vm274_vm0, %v1303_v48, 0.0  ;;  %v1351_v42 = vrot.slane %v1268_v36, 1  ;;  %v386_v60 = vadd.f32 %v370_v40, %v350_v9  ;;  %v441_v57 = vmul.f32 %v2412_v63, %v2048_v20  ;;  %v2695_v40 = vld [vmem:[%s2020_s6 + $0xf0] sm:$0xff] }
  0x8e   : > { %v1331_v39 = vadd.f32 %v1315_v53, %v1107_v32  ;;  %v421_v28 = vadd.f32 %v405_v44, %v385_v50  ;;  %v442_v6 = vmul.f32 %v2415_v0, %v2048_v20  ;;  %v461_v51 = vmul.f32 %v2526_v5, %v2062_v27 }
  0x8f   : > { %v1359_v46 = vsel %vm696_vm3, %v1343_v34, %v1351_v42  ;;  %v1367_v61 = vsel %vm696_vm3, %v1351_v42, %v1343_v34  ;;  %v422_v49 = vadd.f32 %v406_v3, %v386_v60  ;;  %v462_v7 = vmul.f32 %v2539_v26, %v2062_v27 }
  0x90   : > { %v1380_v32 = vsel %vm277_vm1, %v1367_v61, 0.0  ;;  %v1395_v59 = vadd.f32 %v1359_v46, %v1331_v39  ;;  %v497_v10 = vmul.f32 %v2636_v21, %v2087_v41  ;;  %v477_v58 = vadd.f32 %v461_v51, %v441_v57  ;;  %v2712_v46 = vld [vmem:[%s2020_s6 + $0xf8] sm:$0xff] }
  0x91   : > { %v1396_v47 = vadd.f32 %v1380_v32, %v1332_v56  ;;  %v498_v11 = vmul.f32 %v2639_v35, %v2087_v41  ;;  %v533_v13 = vmul.f32 %v2412_v63, %v2093_v45  ;;  %v478_v54 = vadd.f32 %v462_v7, %v442_v6  ;;  %v2686_v63 = vld [vmem:[%s3056_s1 + $0x8] ss:$0 sm:$0xff] }
  0x92   : > { %v1411_v16 = vadd.f32 %v2159_v43, %v1395_v59  ;;  %v534_v55 = vmul.f32 %v2415_v0, %v2093_v45  ;;  %v553_v17 = vmul.f32 %v2526_v5, %v2101_v52  ;;  %v513_v8 = vadd.f32 %v497_v10, %v477_v58 }
  0x93   : > { %v1412_v15 = vadd.f32 %v2159_v43, %v1396_v47  ;;  %v554_v22 = vmul.f32 %v2539_v26, %v2101_v52  ;;  %v589_v62 = vmul.f32 %v2686_v63, %v2636_v21  ;;  %v514_v0 = vadd.f32 %v498_v11, %v478_v54 }
  0x94   : > { %v1427_v25 = vmax.f32 %v1411_v16, 0.0  ;;  %v569_v14 = vadd.f32 %v553_v17, %v533_v13  ;;  %v590_v9 = vmul.f32 %v2686_v63, %v2639_v35  ;;  %v616_v31 = vrot.slane %v513_v8, 7  ;;  %v2737_v8 = vld [vmem:[%s3057_s2] ss:$0 sm:$0xff] }
  0x95   : > { %v1428_v24 = vmax.f32 %v1412_v15, 0.0  ;;  %v570_v43 = vadd.f32 %v554_v22, %v534_v55  ;;  %v1045_v33 = vmul.f32 %v2466_v1, %v2033_v12  ;;  %v624_v36 = vrot.slane %v514_v0, 7 }
  0x96   : > { %v605_v37 = vadd.f32 %v589_v62, %v569_v14  ;;  %v1046_v44 = vmul.f32 %v2483_v2, %v2033_v12  ;;  %v1061_v3 = vmul.f32 %v2582_v29, %v2044_v18  ;;  %v1062_v34 = vmul.f32 %v2585_v23, %v2044_v18 }
  0x97   : > { %v1439_v30 = vpack.c.bf16 %v1428_v24, %v1427_v25  ;;  %v606_v48 = vadd.f32 %v590_v9, %v570_v43  ;;  %v1093_v50 = vmul.f32 %v2695_v40, %v2046_v19  ;;  %v633_v53 = vsel %vm627_vm2, %v616_v31, %v624_v36 }
  0x98   : > { %v641_v56 = vsel %vm627_vm2, %v624_v36, %v616_v31  ;;  %v685_v42 = vrot.slane %v605_v37, 1  ;;  %v1077_v60 = vadd.f32 %v1061_v3, %v1045_v33  ;;  %v675_v57 = vadd.f32 %v633_v53, %v422_v49 }
  0x99   : > { %1888 = vmatprep.mubr.bf16.mxu1 %v1439_v30  ;;  %v658_v39 = vsel %vm274_vm0, %v641_v56, 0.0  ;;  %v693_v6 = vrot.slane %v606_v48, 1  ;;  %v1078_v61 = vadd.f32 %v1062_v34, %v1046_v44  ;;  %v1094_v32 = vmul.f32 %v2712_v46, %v2046_v19 }
  0x9a   : > { %v674_v51 = vadd.f32 %v658_v39, %v421_v28  ;;  %v1109_v59 = vadd.f32 %v1093_v50, %v1077_v60  ;;  %v1125_v7 = vmul.f32 %v2466_v1, %v2048_v20  ;;  %v1126_v49 = vmul.f32 %v2483_v2, %v2048_v20  ;;  %v2760_v60 = vld [vmem:[%s2020_s6 + $0x80] sm:$0xff] }
  0x9b   : > { %v702_v10 = vsel %vm696_vm3, %v685_v42, %v693_v6  ;;  %v710_v47 = vsel %vm696_vm3, %v693_v6, %v685_v42  ;;  %v1141_v58 = vmul.f32 %v2582_v29, %v2062_v27  ;;  %v1110_v13 = vadd.f32 %v1094_v32, %v1078_v61 }
  0x9c   : > { %v728_v28 = vsel %vm277_vm1, %v710_v47, 0.0  ;;  %v743_v11 = vadd.f32 %v702_v10, %v674_v51  ;;  %v1142_v16 = vmul.f32 %v2585_v23, %v2062_v27  ;;  %v1173_v17 = vmul.f32 %v2695_v40, %v2087_v41 }
  0x9d   : > { %v744_v54 = vadd.f32 %v728_v28, %v675_v57  ;;  %v1157_v55 = vadd.f32 %v1141_v58, %v1125_v7  ;;  %v1174_v15 = vmul.f32 %v2712_v46, %v2087_v41  ;;  %v1205_v25 = vmul.f32 %v2466_v1, %v2093_v45 }
  0x9e   : > { %v765_v22 = vadd.f32 %v2737_v8, %v743_v11  ;;  %v1158_v62 = vadd.f32 %v1142_v16, %v1126_v49  ;;  %v1206_v0 = vmul.f32 %v2483_v2, %v2093_v45  ;;  %v1221_v24 = vmul.f32 %v2582_v29, %v2101_v52  ;;  %v2773_v49 = vld [vmem:[%s2020_s6 + $0x88] sm:$0xff] }
  0x9f   : > { %v766_v14 = vadd.f32 %v2737_v8, %v744_v54  ;;  %v1189_v9 = vadd.f32 %v1173_v17, %v1157_v55  ;;  %v1222_v43 = vmul.f32 %v2585_v23, %v2101_v52  ;;  %v1253_v37 = vmul.f32 %v2686_v63, %v2695_v40 }
  0xa0   : > { %v781_v31 = vmax.f32 %v765_v22, 0.0  ;;  %v1190_v33 = vadd.f32 %v1174_v15, %v1158_v62  ;;  %v1254_v1 = vmul.f32 %v2686_v63, %v2712_v46  ;;  %v1237_v2 = vadd.f32 %v1221_v24, %v1205_v25 }
  0xa1   : > { %v782_v36 = vmax.f32 %v766_v14, 0.0  ;;  %v1238_v44 = vadd.f32 %v1222_v43, %v1206_v0  ;;  %v1280_v3 = vrot.slane %v1189_v9, 7  ;;  %v351_v48 = vmul.f32 %v2526_v5, %v2033_v12 }
  0xa2   : > { %v1288_v30 = vrot.slane %v1190_v33, 7  ;;  %v352_v34 = vmul.f32 %v2539_v26, %v2033_v12  ;;  %v371_v50 = vmul.f32 %v2636_v21, %v2044_v18  ;;  %v1269_v56 = vadd.f32 %v1253_v37, %v1237_v2 }
  0xa3   : > { %v792_v53 = vpack.c.bf16 %v782_v36, %v781_v31  ;;  %v1270_v42 = vadd.f32 %v1254_v1, %v1238_v44  ;;  %v372_v39 = vmul.f32 %v2639_v35, %v2044_v18  ;;  %v407_v51 = vmul.f32 %v2760_v60, %v2046_v19 }
  0xa4   : > { %v1296_v57 = vsel %vm627_vm2, %v1280_v3, %v1288_v30  ;;  %v1304_v6 = vsel %vm627_vm2, %v1288_v30, %v1280_v3  ;;  %v387_v61 = vadd.f32 %v371_v50, %v351_v48  ;;  %v1344_v10 = vrot.slane %v1269_v56, 1 }
  0xa5   : > { %1857 = vmatmul.mubr.bf16.gmra.mrb[8].mxu0 %v792_v53  ;;  %v1317_v32 = vsel %vm274_vm0, %v1304_v6, 0.0  ;;  %v1334_v7 = vadd.f32 %v1296_v57, %v1110_v13  ;;  %v1352_v47 = vrot.slane %v1270_v42, 1  ;;  %v388_v28 = vadd.f32 %v372_v39, %v352_v34 }
  0xa6   : > { %v1333_v58 = vadd.f32 %v1317_v32, %v1109_v59  ;;  %v408_v11 = vmul.f32 %v2773_v49, %v2046_v19  ;;  %v423_v16 = vadd.f32 %v407_v51, %v387_v61  ;;  %v443_v17 = vmul.f32 %v2526_v5, %v2048_v20  ;;  %v2816_v32 = vld [vmem:[%s2020_s6 + $0x100] sm:$0xff] }
  0xa7   : > { %v1360_v54 = vsel %vm696_vm3, %v1344_v10, %v1352_v47  ;;  %v1368_v55 = vsel %vm696_vm3, %v1352_v47, %v1344_v10  ;;  %v444_v13 = vmul.f32 %v2539_v26, %v2048_v20  ;;  %v463_v62 = vmul.f32 %v2636_v21, %v2062_v27 }
  0xa8   : > { %v1382_v59 = vsel %vm277_vm1, %v1368_v55, 0.0  ;;  %v1397_v15 = vadd.f32 %v1360_v54, %v1333_v58  ;;  %v424_v22 = vadd.f32 %v408_v11, %v388_v28  ;;  %v464_v0 = vmul.f32 %v2639_v35, %v2062_v27 }
  0xa9   : > { %v1398_v25 = vadd.f32 %v1382_v59, %v1334_v7  ;;  %v499_v14 = vmul.f32 %v2760_v60, %v2087_v41  ;;  %v500_v9 = vmul.f32 %v2773_v49, %v2087_v41  ;;  %v479_v43 = vadd.f32 %v463_v62, %v443_v17  ;;  %v2819_v7 = vld [vmem:[%s2020_s6 + $0x108] sm:$0xff] }
  0xaa   : > { %v1413_v24 = vadd.f32 %v2737_v8, %v1397_v15  ;;  %v535_v31 = vmul.f32 %v2526_v5, %v2093_v45  ;;  %v536_v33 = vmul.f32 %v2539_v26, %v2093_v45  ;;  %v480_v1 = vadd.f32 %v464_v0, %v444_v13 }
  0xab   : > { %v1414_v37 = vadd.f32 %v2737_v8, %v1398_v25  ;;  %v555_v36 = vmul.f32 %v2636_v21, %v2101_v52  ;;  %v556_v2 = vmul.f32 %v2639_v35, %v2101_v52  ;;  %v515_v3 = vadd.f32 %v499_v14, %v479_v43 }
  0xac   : > { %v1429_v44 = vmax.f32 %v1413_v24, 0.0  ;;  %v591_v30 = vmul.f32 %v2686_v63, %v2760_v60  ;;  %v592_v5 = vmul.f32 %v2686_v63, %v2773_v49  ;;  %v516_v48 = vadd.f32 %v500_v9, %v480_v1 }
  0xad   : > { %v1430_v26 = vmax.f32 %v1414_v37, 0.0  ;;  %v571_v34 = vadd.f32 %v555_v36, %v535_v31  ;;  %v572_v50 = vadd.f32 %v556_v2, %v536_v33  ;;  %v617_v53 = vrot.slane %v515_v3, 7 }
  0xae   : > { %v1047_v56 = vmul.f32 %v2582_v29, %v2033_v12  ;;  %v1048_v42 = vmul.f32 %v2585_v23, %v2033_v12  ;;  %v1063_v39 = vmul.f32 %v2695_v40, %v2044_v18  ;;  %v625_v51 = vrot.slane %v516_v48, 7 }
  0xaf   : > { %v1440_v57 = vpack.c.bf16 %v1430_v26, %v1429_v44  ;;  %v607_v6 = vadd.f32 %v591_v30, %v571_v34  ;;  %v608_v61 = vadd.f32 %v592_v5, %v572_v50  ;;  %v1064_v10 = vmul.f32 %v2712_v46, %v2044_v18 }
  0xb0   : > { %v1079_v47 = vadd.f32 %v1063_v39, %v1047_v56  ;;  %v1095_v58 = vmul.f32 %v2816_v32, %v2046_v19  ;;  %v1096_v28 = vmul.f32 %v2819_v7, %v2046_v19  ;;  %v634_v11 = vsel %vm627_vm2, %v617_v53, %v625_v51 }
  0xb1   : > { %1889 = vmatmul.mubr.bf16.gmra.mrb[8].mxu1 %v1440_v57  ;;  %v642_v54 = vsel %vm627_vm2, %v625_v51, %v617_v53  ;;  %v686_v55 = vrot.slane %v607_v6, 1  ;;  %v694_v17 = vrot.slane %v608_v61, 1  ;;  %v677_v59 = vadd.f32 %v634_v11, %v424_v22  ;;  %v1721_v11 = vld [vmem:[%s2020_s6 + $0x98] sm:$0xff] }
  0xb2   : > { %v660_v13 = vsel %vm274_vm0, %v642_v54, 0.0  ;;  %v1080_v15 = vadd.f32 %v1064_v10, %v1048_v42  ;;  %v1111_v62 = vadd.f32 %v1095_v58, %v1079_v47  ;;  %v1127_v9 = vmul.f32 %v2582_v29, %v2048_v20 }
  0xb3   : > { %v676_v25 = vadd.f32 %v660_v13, %v423_v16  ;;  %v703_v0 = vsel %vm696_vm3, %v686_v55, %v694_v17  ;;  %v711_v14 = vsel %vm696_vm3, %v694_v17, %v686_v55  ;;  %v1128_v31 = vmul.f32 %v2585_v23, %v2048_v20 }
  0xb4   : > { %v730_v24 = vsel %vm277_vm1, %v711_v14, 0.0  ;;  %v1112_v43 = vadd.f32 %v1096_v28, %v1080_v15  ;;  %v1143_v22 = vmul.f32 %v2695_v40, %v2062_v27  ;;  %v1144_v37 = vmul.f32 %v2712_v46, %v2062_v27  ;;  %v1720_v28 = vld [vmem:[%s2020_s6 + $0x90] sm:$0xff] }
  0xb5   : > { %v745_v16 = vadd.f32 %v703_v0, %v676_v25  ;;  %v746_v33 = vadd.f32 %v730_v24, %v677_v59  ;;  %v1175_v1 = vmul.f32 %v2816_v32, %v2087_v41  ;;  %v1176_v2 = vmul.f32 %v2819_v7, %v2087_v41 }
  0xb6   : > { %v1159_v36 = vadd.f32 %v1143_v22, %v1127_v9  ;;  %v1207_v44 = vmul.f32 %v2582_v29, %v2093_v45  ;;  %v1208_v3 = vmul.f32 %v2585_v23, %v2093_v45  ;;  %v1160_v26 = vadd.f32 %v1144_v37, %v1128_v31 }
  0xb7   : > { %v767_v30 = vadd.f32 %v2737_v8, %v745_v16  ;;  %v768_v5 = vadd.f32 %v2737_v8, %v746_v33  ;;  %v1223_v48 = vmul.f32 %v2695_v40, %v2101_v52  ;;  %v1224_v50 = vmul.f32 %v2712_v46, %v2101_v52 }
  0xb8   : > { %v1191_v34 = vadd.f32 %v1175_v1, %v1159_v36  ;;  %v1255_v29 = vmul.f32 %v2686_v63, %v2816_v32  ;;  %v1256_v23 = vmul.f32 %v2686_v63, %v2819_v7  ;;  %v1192_v42 = vadd.f32 %v1176_v2, %v1160_v26 }
  0xb9   : > { %v783_v53 = vmax.f32 %v767_v30, 0.0  ;;  %v784_v56 = vmax.f32 %v768_v5, 0.0  ;;  %v1239_v39 = vadd.f32 %v1223_v48, %v1207_v44  ;;  %v1240_v57 = vadd.f32 %v1224_v50, %v1208_v3 }
  0xba   : > { %v1281_v6 = vrot.slane %v1191_v34, 7  ;;  %v353_v61 = vmul.f32 %v2636_v21, %v2033_v12  ;;  %v354_v51 = vmul.f32 %v2639_v35, %v2033_v12  ;;  %v1289_v58 = vrot.slane %v1192_v42, 7 }
  0xbb   : > { %v793_v10 = vpack.c.bf16 %v784_v56, %v783_v53  ;;  %v1271_v47 = vadd.f32 %v1255_v29, %v1239_v39  ;;  %v373_v54 = vmul.f32 %v2760_v60, %v2044_v18  ;;  %v1272_v55 = vadd.f32 %v1256_v23, %v1240_v57 }
  0xbc   : > { %v374_v17 = vmul.f32 %v2773_v49, %v2044_v18  ;;  %v409_v13 = vmul.f32 %v1720_v28, %v2046_v19  ;;  %v410_v59 = vmul.f32 %v1721_v11, %v2046_v19  ;;  %v1297_v15 = vsel %vm627_vm2, %v1281_v6, %v1289_v58 }
  0xbd   : > { %1860 = vmatprep.mubr.bf16.mxu0 %v793_v10  ;;  %v1305_v25 = vsel %vm627_vm2, %v1289_v58, %v1281_v6  ;;  %v1345_v0 = vrot.slane %v1271_v47, 1  ;;  %v389_v14 = vadd.f32 %v373_v54, %v353_v61  ;;  %v1336_v24 = vadd.f32 %v1297_v15, %v1112_v43 }
  0xbe   : > { %v1319_v9 = vsel %vm274_vm0, %v1305_v25, 0.0  ;;  %v1353_v31 = vrot.slane %v1272_v55, 1  ;;  %v390_v22 = vadd.f32 %v374_v17, %v354_v51  ;;  %v445_v37 = vmul.f32 %v2636_v21, %v2048_v20 }
  0xbf   : > { %v1335_v16 = vadd.f32 %v1319_v9, %v1111_v62  ;;  %v425_v33 = vadd.f32 %v409_v13, %v389_v14  ;;  %v446_v1 = vmul.f32 %v2639_v35, %v2048_v20  ;;  %v465_v43 = vmul.f32 %v2760_v60, %v2062_v27 }
  0xc0   : > { %v1361_v36 = vsel %vm696_vm3, %v1345_v0, %v1353_v31  ;;  %v1369_v2 = vsel %vm696_vm3, %v1353_v31, %v1345_v0  ;;  %v426_v44 = vadd.f32 %v410_v59, %v390_v22  ;;  %v466_v30 = vmul.f32 %v2773_v49, %v2062_v27  ;;  %v1779_v59 = vld [vmem:[%s2020_s6 + $0x110] sm:$0xff]  ;;  %v1780_v31 = vld [vmem:[%s2020_s6 + $0x118] sm:$0xff] }
  0xc1   : > { %v1384_v62 = vsel %vm277_vm1, %v1369_v2, 0.0  ;;  %v1399_v3 = vadd.f32 %v1361_v36, %v1335_v16  ;;  %v501_v5 = vmul.f32 %v1720_v28, %v2087_v41  ;;  %v481_v48 = vadd.f32 %v465_v43, %v445_v37 }
  0xc2   : > { %v1400_v26 = vadd.f32 %v1384_v62, %v1336_v24  ;;  %v502_v34 = vmul.f32 %v1721_v11, %v2087_v41  ;;  %v537_v50 = vmul.f32 %v2636_v21, %v2093_v45  ;;  %v482_v23 = vadd.f32 %v466_v30, %v446_v1 }
  0xc3   : > { %v1415_v29 = vadd.f32 %v2737_v8, %v1399_v3  ;;  %v538_v53 = vmul.f32 %v2639_v35, %v2093_v45  ;;  %v557_v56 = vmul.f32 %v2760_v60, %v2101_v52  ;;  %v517_v39 = vadd.f32 %v501_v5, %v481_v48 }
  0xc4   : > { %v1416_v42 = vadd.f32 %v2737_v8, %v1400_v26  ;;  %v558_v57 = vmul.f32 %v2773_v49, %v2101_v52  ;;  %v593_v6 = vmul.f32 %v2686_v63, %v1720_v28  ;;  %v518_v21 = vadd.f32 %v502_v34, %v482_v23 }
  0xc5   : > { %v1431_v61 = vmax.f32 %v1415_v29, 0.0  ;;  %v573_v51 = vadd.f32 %v557_v56, %v537_v50  ;;  %v594_v10 = vmul.f32 %v2686_v63, %v1721_v11  ;;  %v618_v35 = vrot.slane %v517_v39, 7 }
  0xc6   : > { %v1432_v47 = vmax.f32 %v1416_v42, 0.0  ;;  %v574_v58 = vadd.f32 %v558_v57, %v538_v53  ;;  %v1049_v60 = vmul.f32 %v2695_v40, %v2033_v12  ;;  %v626_v55 = vrot.slane %v518_v21, 7 }
  0xc7   : > { %v609_v54 = vadd.f32 %v593_v6, %v573_v51  ;;  %v1050_v49 = vmul.f32 %v2712_v46, %v2033_v12  ;;  %v1065_v28 = vmul.f32 %v2816_v32, %v2044_v18  ;;  %v1066_v11 = vmul.f32 %v2819_v7, %v2044_v18 }
  0xc8   : > { %v1441_v17 = vpack.c.bf16 %v1432_v47, %v1431_v61  ;;  %v610_v13 = vadd.f32 %v594_v10, %v574_v58  ;;  %v635_v15 = vsel %vm627_vm2, %v618_v35, %v626_v55  ;;  %v643_v25 = vsel %vm627_vm2, %v626_v55, %v618_v35 }
  0xc9   : > { %v687_v0 = vrot.slane %v609_v54, 1  ;;  %v1097_v14 = vmul.f32 %v1779_v59, %v2046_v19  ;;  %v662_v12 = vsel %vm274_vm0, %v643_v25, 0.0  ;;  %v679_v9 = vadd.f32 %v635_v15, %v426_v44 }
  0xca   : > { %1892 = vmatprep.mubr.bf16.mxu1 %v1441_v17  ;;  %v695_v24 = vrot.slane %v610_v13, 1  ;;  %v1082_v22 = vadd.f32 %v1066_v11, %v1050_v49  ;;  %v678_v16 = vadd.f32 %v662_v12, %v425_v33  ;;  %v1081_v37 = vadd.f32 %v1065_v28, %v1049_v60 }
  0xcb   : > { %v1098_v18 = vmul.f32 %v1780_v31, %v2046_v19  ;;  %v1129_v1 = vmul.f32 %v2695_v40, %v2048_v20  ;;  %v1130_v43 = vmul.f32 %v2712_v46, %v2048_v20  ;;  %v1145_v44 = vmul.f32 %v2816_v32, %v2062_v27 }
  0xcc   : > { %v704_v36 = vsel %vm696_vm3, %v687_v0, %v695_v24  ;;  %v712_v2 = vsel %vm696_vm3, %v695_v24, %v687_v0  ;;  %v1146_v3 = vmul.f32 %v2819_v7, %v2062_v27  ;;  %v1177_v26 = vmul.f32 %v1779_v59, %v2087_v41  ;;  %v2974_v0 = vld [vmem:[%s3059_s4] ss:$0 sm:$0xff] }
  0xcd   : > { %v732_v33 = vsel %vm277_vm1, %v712_v2, 0.0  ;;  %v747_v62 = vadd.f32 %v704_v36, %v678_v16  ;;  %v1114_v19 = vadd.f32 %v1098_v18, %v1082_v22  ;;  %v1161_v5 = vadd.f32 %v1145_v44, %v1129_v1 }
  0xce   : > { %v748_v30 = vadd.f32 %v732_v33, %v679_v9  ;;  %v1178_v48 = vmul.f32 %v1780_v31, %v2087_v41  ;;  %v1162_v20 = vadd.f32 %v1146_v3, %v1130_v43  ;;  %v1209_v50 = vmul.f32 %v2695_v40, %v2093_v45 }
  0xcf   : > { %v769_v34 = vadd.f32 %v2737_v8, %v747_v62  ;;  %v1210_v29 = vmul.f32 %v2712_v46, %v2093_v45  ;;  %v1193_v53 = vadd.f32 %v1177_v26, %v1161_v5  ;;  %v1225_v27 = vmul.f32 %v2816_v32, %v2101_v52 }
  0xd0   : > { %v770_v23 = vadd.f32 %v2737_v8, %v748_v30  ;;  %v1226_v56 = vmul.f32 %v2819_v7, %v2101_v52  ;;  %v1194_v41 = vadd.f32 %v1178_v48, %v1162_v20  ;;  %v1257_v39 = vmul.f32 %v2686_v63, %v1779_v59 }
  0xd1   : > { %v785_v42 = vmax.f32 %v769_v34, 0.0  ;;  %v1258_v57 = vmul.f32 %v2686_v63, %v1780_v31  ;;  %v1241_v40 = vadd.f32 %v1225_v27, %v1209_v50  ;;  %v1282_v21 = vrot.slane %v1193_v53, 7 }
  0xd2   : > { %v786_v6 = vmax.f32 %v770_v23, 0.0  ;;  %v1242_v61 = vadd.f32 %v1226_v56, %v1210_v29  ;;  %v1113_v45 = vadd.f32 %v1097_v14, %v1081_v37  ;;  %v1290_v46 = vrot.slane %v1194_v41, 7 }
  0xd3   : > { %v1273_v10 = vadd.f32 %v1257_v39, %v1241_v40 }
  0xd4   : > { %v794_v51 = vpack.c.bf16 %v786_v6, %v785_v42  ;;  %v1274_v47 = vadd.f32 %v1258_v57, %v1242_v61  ;;  %v1298_v32 = vsel %vm627_vm2, %v1282_v21, %v1290_v46  ;;  %v1306_v52 = vsel %vm627_vm2, %v1290_v46, %v1282_v21 }
  0xd5   : > { %v1321_v7 = vsel %vm274_vm0, %v1306_v52, 0.0  ;;  %v1338_v63 = vadd.f32 %v1298_v32, %v1114_v19  ;;  %v1346_v58 = vrot.slane %v1273_v10, 1 }
  0xd6   : > { %1861 = vmatmul.mubr.bf16.gmra.mrb[12].mxu0 %v794_v51  ;;  %v1354_v35 = vrot.slane %v1274_v47, 1  ;;  %v1337_v60 = vadd.f32 %v1321_v7, %v1113_v45 }
  0xd8   : > { %v1362_v54 = vsel %vm696_vm3, %v1346_v58, %v1354_v35  ;;  %v1370_v55 = vsel %vm696_vm3, %v1354_v35, %v1346_v58 }
  0xd9   : > { %v1386_v49 = vsel %vm277_vm1, %v1370_v55, 0.0  ;;  %v1401_v28 = vadd.f32 %v1362_v54, %v1337_v60 }
  0xda   : > { %v1402_v17 = vadd.f32 %v1386_v49, %v1338_v63 }
  0xdb   : > { %v1417_v13 = vadd.f32 %v2737_v8, %v1401_v28 }
  0xdc   : > { %v1418_v59 = vadd.f32 %v2737_v8, %v1402_v17 }
  0xdd   : > { %v1433_v11 = vmax.f32 %v1417_v13, 0.0 }
  0xde   : > { %v1434_v15 = vmax.f32 %v1418_v59, 0.0 }
  0xe0   : > { %v1442_v25 = vpack.c.bf16 %v1434_v15, %v1433_v11 }
  0xe2   : > { %1893 = vmatmul.mubr.bf16.gmra.mrb[12].mxu1 %v1442_v25 }
 0x116   : > { %v1850_v4 = vpop.f32.mrb[0].mxu0 }
 0x117   : > { %v892_v38 = vadd.f32 %v1850_v4, %v2974_v0  ;;  %v883_v14 = vpop.f32.mrb[1].mxu0 }
 0x118   : > { %v884_v8 = vadd.f32 %v2974_v0, %v883_v14  ;;  %v1851_v12 = vpop.f32.mrb[2].mxu0 }
 0x119   : > { %v948_v9 = vmax.f32 %v892_v38, 0.0  ;;  %v895_v24 = vadd.f32 %v1851_v12, %v2974_v0  ;;  %v886_v31 = vpop.f32.mrb[3].mxu0 }
 0x11a   : > { %v946_v22 = vmax.f32 %v884_v8, 0.0  ;;  %v887_v16 = vadd.f32 %v2974_v0, %v886_v31 }
 0x11b   : > { %964 = vst [vmem:[%s2981_s11 + $0x10] sm:$0xff] %v948_v9  ;;  %v949_v37 = vmax.f32 %v895_v24, 0.0 }
 0x11c   : > { %962 = vst [vmem:[%s2981_s11] sm:$0xff] %v946_v22  ;;  %v947_v18 = vmax.f32 %v887_v16, 0.0 }
 0x11d   : > { %965 = vst [vmem:[%s2981_s11 + $0x18] sm:$0xff] %v949_v37 }
 0x11e   : > { %963 = vst [vmem:[%s2981_s11 + $0x8] sm:$0xff] %v947_v18 }
 0x122   : > { %v1882_v1 = vpop.f32.mrb[0].mxu1 }
 0x123   : > { %v1486_v36 = vadd.f32 %v1882_v1, %v2974_v0  ;;  %v1477_v2 = vpop.f32.mrb[1].mxu1 }
 0x124   : > { %v1478_v43 = vadd.f32 %v2974_v0, %v1477_v2  ;;  %v1883_v44 = vpop.f32.mrb[2].mxu1 }
 0x125   : > { %v1542_v33 = vmax.f32 %v1486_v36, 0.0  ;;  %v1489_v62 = vadd.f32 %v1883_v44, %v2974_v0  ;;  %v1480_v19 = vpop.f32.mrb[3].mxu1 }
 0x126   : > { %v1540_v3 = vmax.f32 %v1478_v43, 0.0  ;;  %v1481_v30 = vadd.f32 %v2974_v0, %v1480_v19 }
 0x127   : > { %1783 = vst [vmem:[%s2981_s11 + $0x90] sm:$0xff] %v1542_v33  ;;  %v1543_v5 = vmax.f32 %v1489_v62, 0.0 }
 0x128   : > { %1781 = vst [vmem:[%s2981_s11 + $0x80] sm:$0xff] %v1540_v3  ;;  %v1541_v26 = vmax.f32 %v1481_v30, 0.0 }
 0x129   : > { %1784 = vst [vmem:[%s2981_s11 + $0x98] sm:$0xff] %v1543_v5 }
 0x12a   : > { %1782 = vst [vmem:[%s2981_s11 + $0x88] sm:$0xff] %v1541_v26 }
 0x147   : > { %v1854_v48 = vpop.f32.mrb[4].mxu0 }
 0x148   : > { %v908_v34 = vadd.f32 %v1854_v48, %v2974_v0  ;;  %v899_v20 = vpop.f32.mrb[5].mxu0 }
 0x149   : > { %v900_v50 = vadd.f32 %v2974_v0, %v899_v20  ;;  %v1855_v29 = vpop.f32.mrb[6].mxu0 }
 0x14a   : > { %v952_v23 = vmax.f32 %v908_v34, 0.0  ;;  %v911_v53 = vadd.f32 %v1855_v29, %v2974_v0  ;;  %v902_v27 = vpop.f32.mrb[7].mxu0 }
 0x14b   : > { %v950_v56 = vmax.f32 %v900_v50, 0.0  ;;  %v903_v42 = vadd.f32 %v2974_v0, %v902_v27 }
 0x14c   : > { %968 = vst [vmem:[%s2981_s11 + $0x30] sm:$0xff] %v952_v23  ;;  %v953_v41 = vmax.f32 %v911_v53, 0.0 }
 0x14d   : > { %966 = vst [vmem:[%s2981_s11 + $0x20] sm:$0xff] %v950_v56  ;;  %v951_v39 = vmax.f32 %v903_v42, 0.0 }
 0x14e   : > { %969 = vst [vmem:[%s2981_s11 + $0x38] sm:$0xff] %v953_v41 }
 0x14f   : > { %967 = vst [vmem:[%s2981_s11 + $0x28] sm:$0xff] %v951_v39 }
 0x153   : > { %v1886_v57 = vpop.f32.mrb[4].mxu1 }
 0x154   : > { %v1502_v6 = vadd.f32 %v1886_v57, %v2974_v0  ;;  %v1493_v40 = vpop.f32.mrb[5].mxu1 }
 0x155   : > { %v1494_v61 = vadd.f32 %v2974_v0, %v1493_v40  ;;  %v1887_v21 = vpop.f32.mrb[6].mxu1 }
 0x156   : > { %v1546_v45 = vmax.f32 %v1502_v6, 0.0  ;;  %v1505_v46 = vadd.f32 %v1887_v21, %v2974_v0  ;;  %v1496_v51 = vpop.f32.mrb[7].mxu1 }
 0x157   : > { %v1544_v10 = vmax.f32 %v1494_v61, 0.0  ;;  %v1497_v47 = vadd.f32 %v2974_v0, %v1496_v51 }
 0x158   : > { %1787 = vst [vmem:[%s2981_s11 + $0xb0] sm:$0xff] %v1546_v45  ;;  %v1547_v32 = vmax.f32 %v1505_v46, 0.0 }
 0x159   : > { %1785 = vst [vmem:[%s2981_s11 + $0xa0] sm:$0xff] %v1544_v10  ;;  %v1545_v52 = vmax.f32 %v1497_v47, 0.0 }
 0x15a   : > { %1788 = vst [vmem:[%s2981_s11 + $0xb8] sm:$0xff] %v1547_v32 }
 0x15b   : > { %1786 = vst [vmem:[%s2981_s11 + $0xa8] sm:$0xff] %v1545_v52 }
 0x178   : > { %v1858_v7 = vpop.f32.mrb[8].mxu0 }
 0x179   : > { %v924_v63 = vadd.f32 %v1858_v7, %v2974_v0  ;;  %v915_v58 = vpop.f32.mrb[9].mxu0 }
 0x17a   : > { %v916_v35 = vadd.f32 %v2974_v0, %v915_v58  ;;  %v1859_v60 = vpop.f32.mrb[10].mxu0 }
 0x17b   : > { %v956_v54 = vmax.f32 %v924_v63, 0.0  ;;  %v927_v55 = vadd.f32 %v1859_v60, %v2974_v0  ;;  %v918_v49 = vpop.f32.mrb[11].mxu0 }
 0x17c   : > { %v954_v28 = vmax.f32 %v916_v35, 0.0  ;;  %v919_v17 = vadd.f32 %v2974_v0, %v918_v49 }
 0x17d   : > { %972 = vst [vmem:[%s2981_s11 + $0x50] sm:$0xff] %v956_v54  ;;  %v957_v13 = vmax.f32 %v927_v55, 0.0 }
 0x17e   : > { %970 = vst [vmem:[%s2981_s11 + $0x40] sm:$0xff] %v954_v28  ;;  %v955_v59 = vmax.f32 %v919_v17, 0.0 }
 0x17f   : > { %973 = vst [vmem:[%s2981_s11 + $0x58] sm:$0xff] %v957_v13 }
 0x180   : > { %971 = vst [vmem:[%s2981_s11 + $0x48] sm:$0xff] %v955_v59 }
 0x184   : > { %v1890_v11 = vpop.f32.mrb[8].mxu1 }
 0x185   : > { %v1518_v15 = vadd.f32 %v1890_v11, %v2974_v0  ;;  %v1509_v25 = vpop.f32.mrb[9].mxu1 }
 0x186   : > { %v1510_v4 = vadd.f32 %v2974_v0, %v1509_v25  ;;  %v1891_v38 = vpop.f32.mrb[10].mxu1 }
 0x187   : > { %v1550_v14 = vmax.f32 %v1518_v15, 0.0  ;;  %v1521_v8 = vadd.f32 %v1891_v38, %v2974_v0  ;;  %v1512_v12 = vpop.f32.mrb[11].mxu1 }
 0x188   : > { %v1548_v9 = vmax.f32 %v1510_v4, 0.0  ;;  %v1513_v24 = vadd.f32 %v2974_v0, %v1512_v12 }
 0x189   : > { %1791 = vst [vmem:[%s2981_s11 + $0xd0] sm:$0xff] %v1550_v14  ;;  %v1551_v31 = vmax.f32 %v1521_v8, 0.0 }
 0x18a   : > { %1789 = vst [vmem:[%s2981_s11 + $0xc0] sm:$0xff] %v1548_v9  ;;  %v1549_v22 = vmax.f32 %v1513_v24, 0.0 }
 0x18b   : > { %1792 = vst [vmem:[%s2981_s11 + $0xd8] sm:$0xff] %v1551_v31 }
 0x18c   : > { %1790 = vst [vmem:[%s2981_s11 + $0xc8] sm:$0xff] %v1549_v22 }
 0x1a9   : > { %v1862_v16 = vpop.f32.mrb[12].mxu0 }
 0x1aa   : > { %v940_v37 = vadd.f32 %v1862_v16, %v2974_v0  ;;  %v931_v18 = vpop.f32.mrb[13].mxu0 }
 0x1ab   : > { %v932_v1 = vadd.f32 %v2974_v0, %v931_v18  ;;  %v1863_v36 = vpop.f32.mrb[14].mxu0 }
 0x1ac   : > { %v960_v2 = vmax.f32 %v940_v37, 0.0  ;;  %v943_v43 = vadd.f32 %v1863_v36, %v2974_v0  ;;  %v934_v44 = vpop.f32.mrb[15].mxu0 }
 0x1ad   : > { %v958_v33 = vmax.f32 %v932_v1, 0.0  ;;  %v935_v62 = vadd.f32 %v2974_v0, %v934_v44 }
 0x1ae   : > { %976 = vst [vmem:[%s2981_s11 + $0x70] sm:$0xff] %v960_v2  ;;  %v961_v19 = vmax.f32 %v943_v43, 0.0 }
 0x1af   : > { %974 = vst [vmem:[%s2981_s11 + $0x60] sm:$0xff] %v958_v33  ;;  %v959_v3 = vmax.f32 %v935_v62, 0.0 }
 0x1b0   : > { %977 = vst [vmem:[%s2981_s11 + $0x78] sm:$0xff] %v961_v19 }
 0x1b1   : > { %975 = vst [vmem:[%s2981_s11 + $0x68] sm:$0xff] %v959_v3 }
 0x1b5   : > { %v1894_v30 = vpop.f32.mrb[12].mxu1 }
 0x1b6   : > { %v1534_v5 = vadd.f32 %v1894_v30, %v2974_v0  ;;  %v1525_v26 = vpop.f32.mrb[13].mxu1 }
 0x1b7   : > { %v1526_v48 = vadd.f32 %v2974_v0, %v1525_v26  ;;  %v1895_v34 = vpop.f32.mrb[14].mxu1 }
 0x1b8   : > { %v1554_v20 = vmax.f32 %v1534_v5, 0.0  ;;  %v1537_v50 = vadd.f32 %v1895_v34, %v2974_v0  ;;  %v1528_v29 = vpop.f32.mrb[15].mxu1 }
 0x1b9   : > { %v1552_v23 = vmax.f32 %v1526_v48, 0.0  ;;  %v1529_v53 = vadd.f32 %v2974_v0, %v1528_v29 }
 0x1ba   : > { %1795 = vst [vmem:[%s2981_s11 + $0xf0] sm:$0xff] %v1554_v20  ;;  %v1555_v27 = vmax.f32 %v1537_v50, 0.0 }
 0x1bb   : > { %1793 = vst [vmem:[%s2981_s11 + $0xe0] sm:$0xff] %v1552_v23  ;;  %v1553_v56 = vmax.f32 %v1529_v53, 0.0 }
 0x1bc   : > { %1796 = vst [vmem:[%s2981_s11 + $0xf8] sm:$0xff] %v1555_v27 }
 0x1bd   : > { %1794 = vst [vmem:[%s2981_s11 + $0xe8] sm:$0xff] %v1553_v56 }
 0x1be PF: > { %s15_s20 = sadd.s32 1, %s1953_s20   ;;  %s3061_s18 = smov %s1949_s19 }
 0x1bf   : > { %p12_p5 = scmp.ge.s32.totalorder %s15_s20, 4   ;;  %s3062_s19 = smov %s3064_s21 }
 0x1c1   :  { %14 = sbr.rel (!%p12_p5) target bundleno = 2 (0x2), region = 77 }

</bundles_post_ra>
